<compile_context>
chip_gen: v7x
topology: tpu7x:2x2x1
jax: 0.10.0
libtpu: 0.0.40
codegen_flags: <defaults>
</compile_context>

<pallas_src>
import functools

import jax
import jax.numpy as jnp
from jax import lax
from jax.experimental import pallas as pl
from jax.experimental.pallas import tpu as pltpu


def _bottleneck_kernel(*refs, has_expand, residual, stride, dims):
    H, W, Cin, Cm, Cout, Ho, Wo = dims
    HW = H * W

    refs = list(refs)
    x_ref = refs.pop(0)
    wexp_ref = refs.pop(0) if has_expand else None
    eb_ref = refs.pop(0) if has_expand else None
    wdw_ref, db_ref, wpt_ref, pb_ref, cidx_ref, out_ref = refs

    x2 = x_ref[0]                                         # (Cin, H*W) f32

    # ---- 1x1 expand conv (BN scale pre-folded) + bias + ReLU6 : MXU ----
    if has_expand:
        e = jnp.dot(wexp_ref[...], x2.astype(jnp.bfloat16),
                    preferred_element_type=jnp.float32)   # (Cm, HW) f32
        e = jnp.clip(e + eb_ref[...], 0.0, 6.0)
    else:
        e = x2                                            # Cm == Cin

    # ---- 3x3 depthwise conv + BN bias + ReLU6 : XLU rolls + VPU FMAs ----
    # Zero padding is realised by masking the rolled-in (wrapped) lanes.
    pp = lax.broadcasted_iota(jnp.int32, (1, HW), 1)      # flat position h*W+w
    cc = cidx_ref[...]                                    # column index w
    off = 1 if stride == 1 else 0       # ZeroPad2d(1) vs ZeroPad2d((0,1,0,1))
    acc = jnp.zeros((Cm, HW), jnp.float32)
    for ki in range(3):
        dh = ki - off
        for kj in range(3):
            dw = kj - off
            s = dh * W + dw
            tap = pltpu.roll(e, (-s) % HW, axis=1) if s else e
            conds = []
            if dh < 0:
                conds.append(pp >= (-dh) * W)
            elif dh > 0:
                conds.append(pp < (H - dh) * W)
            if dw < 0:
                conds.append(cc >= -dw)
            elif dw > 0:
                conds.append(cc < W - dw)
            if conds:
                m = conds[0]
                for extra in conds[1:]:
                    m = jnp.logical_and(m, extra)
                tap = jnp.where(m, tap, 0.0)
            k = ki * 3 + kj
            acc = acc + tap * wdw_ref[:, k:k + 1]
    acc = jnp.clip(acc + db_ref[...], 0.0, 6.0)           # (Cm, HW)

    if stride == 1:
        d = acc                                           # Ho*Wo == HW
    else:
        # Even-row / even-column subsample, done once.  Rows are contiguous
        # lane chunks; columns are compacted by a tiny 0/1 selection matmul
        # (bf16 operands are exact selections and match the project cast).
        sel = (lax.broadcasted_iota(jnp.int32, (W, Wo), 0) ==
               2 * lax.broadcasted_iota(jnp.int32, (W, Wo), 1)
               ).astype(jnp.bfloat16)                     # (W, Wo)
        parts = []
        for ho in range(Ho):
            row = acc[:, 2 * ho * W:2 * ho * W + W].astype(jnp.bfloat16)
            parts.append(jnp.dot(row, sel,
                                 preferred_element_type=jnp.float32))
        d = jnp.concatenate(parts, axis=1)                # (Cm, Ho*Wo)

    # ---- 1x1 project conv (BN scale pre-folded) + bias (+ residual) ----
    o = jnp.dot(wpt_ref[...], d.astype(jnp.bfloat16),
                preferred_element_type=jnp.float32)       # (Cout, Ho*Wo)
    o = o + pb_ref[...]
    if residual:
        o = o + x2                                        # f32 skip add
    out_ref[0] = o.astype(out_ref.dtype)


def inverted_residual_bottleneck(x_nchw, params, *, stride, expansion_ratio):
    """NCHW in / NCHW out wrapper around the fused Pallas kernel."""
    N, Cin, H, W = x_nchw.shape
    Cm = Cin * expansion_ratio
    Cout = params['w_proj'].shape[1]
    has_expand = Cm > Cin
    residual = (Cin == Cout) and (stride == 1)

    if stride == 2:                        # ZeroPad2d((0, 1, 0, 1))
        Ho = (H + 1 - 3) // 2 + 1
        Wo = (W + 1 - 3) // 2 + 1
    else:                                  # ZeroPad2d(1)
        Ho, Wo = H, W
    HW, HWo = H * W, Ho * Wo

    f32, bf16 = jnp.float32, jnp.bfloat16
    # Free reshape (no transpose): the kernel consumes channels-first slabs.
    x = x_nchw.reshape(N, Cin, HW).astype(f32)

    args = [x]
    in_specs = [pl.BlockSpec((1, Cin, HW), lambda n: (n, 0, 0))]

    def add_arg(a):
        nd = a.ndim
        args.append(a)
        in_specs.append(pl.BlockSpec(a.shape, lambda n, _nd=nd: (0,) * _nd))

    # Fold BN scales into the conv weights on the host; 1x1 weights -> bf16.
    if has_expand:
        add_arg((params['w_expand'] * params['expand_scale']).T.astype(bf16))  # (Cm, Cin)
        add_arg(params['expand_bias'].reshape(Cm, 1).astype(f32))              # (Cm, 1)
    add_arg((params['w_dw'] * params['dw_scale']).reshape(9, Cm).T.astype(f32))  # (Cm, 9)
    add_arg(params['dw_bias'].reshape(Cm, 1).astype(f32))                      # (Cm, 1)
    add_arg((params['w_proj'] * params['proj_scale']).T.astype(bf16))          # (Cout, Cm)
    add_arg(params['proj_bias'].reshape(Cout, 1).astype(f32))                  # (Cout, 1)
    add_arg((jnp.arange(HW, dtype=jnp.int32) % W).reshape(1, HW))              # col index

    kernel = functools.partial(
        _bottleneck_kernel, has_expand=has_expand, residual=residual,
        stride=stride, dims=(H, W, Cin, Cm, Cout, Ho, Wo))

    flops = N * (2 * 9 * HW * Cm + 2 * HWo * Cm * Cout)
    if has_expand:
        flops += N * 2 * HW * Cin * Cm
    weight_bytes = sum(int(a.size) * a.dtype.itemsize for a in args[1:])
    bytes_accessed = 4 * (int(x.size) + N * Cout * HWo) + N * weight_bytes

    # Explicit scoped-VMEM budget: double-buffered blocks + in-kernel values.
    block_bytes = 4 * (Cin * HW + Cout * HWo) + weight_bytes
    vmem_limit = int(min(64 << 20,
                         max(16 << 20,
                             2 * block_bytes + 8 * Cm * HW * 4 + (4 << 20))))

    out = pl.pallas_call(
        kernel,
        out_shape=jax.ShapeDtypeStruct((N, Cout, HWo), f32),
        grid=(N,),
        in_specs=in_specs,
        out_specs=pl.BlockSpec((1, Cout, HWo), lambda n: (n, 0, 0)),
        compiler_params=pltpu.CompilerParams(
            dimension_semantics=("parallel",),
            vmem_limit_bytes=vmem_limit),
        cost_estimate=pl.CostEstimate(flops=int(flops), transcendentals=0,
                                      bytes_accessed=int(bytes_accessed)),
    )(*args)
    # Channels-first flat output -> NCHW with a free reshape (no transpose).
    return out.reshape(N, Cout, Ho, Wo)


def init_params(key, in_channels, out_channels, expansion_ratio, eps=1e-5):
    """Deterministic synthetic params; each BN given as per-channel (scale, bias)."""
    Cm = in_channels * expansion_ratio
    ks = jax.random.split(key, 16)

    def bn_fold(kg, kb, km, kv, C):
        gamma = 1.0 + 0.1 * jax.random.normal(kg, (C,))
        beta = 0.1 * jax.random.normal(kb, (C,))
        mean = 0.1 * jax.random.normal(km, (C,))
        var = jax.random.uniform(kv, (C,), minval=0.5, maxval=1.5)
        scale = gamma / jnp.sqrt(var + eps)
        bias = beta - mean * scale
        return (scale.reshape(1, C).astype(jnp.float32),
                bias.reshape(1, C).astype(jnp.float32))

    params = {}
    if Cm > in_channels:
        params['w_expand'] = (0.2 * jax.random.normal(
            ks[0], (in_channels, Cm))).astype(jnp.float32)
        params['expand_scale'], params['expand_bias'] = bn_fold(
            ks[1], ks[2], ks[3], ks[4], Cm)
    params['w_dw'] = (0.2 * jax.random.normal(ks[5], (3, 3, Cm))).astype(jnp.float32)
    params['dw_scale'], params['dw_bias'] = bn_fold(ks[6], ks[7], ks[8], ks[9], Cm)
    params['w_proj'] = (0.2 * jax.random.normal(
        ks[10], (Cm, out_channels))).astype(jnp.float32)
    params['proj_scale'], params['proj_bias'] = bn_fold(
        ks[11], ks[12], ks[13], ks[14], out_channels)
    return params


def reference(x_nchw, params, *, stride, expansion_ratio):
    """Pure-JAX f32 reference using lax.conv (independent of the kernel path)."""
    N, Cin, H, W = x_nchw.shape
    x = jnp.transpose(x_nchw, (0, 2, 3, 1)).astype(jnp.float32)
    Cout = params['w_proj'].shape[1]
    Cm = Cin * expansion_ratio
    dn = ('NHWC', 'HWIO', 'NHWC')
    if 'w_expand' in params:
        e = jax.lax.conv_general_dilated(
            x, params['w_expand'].reshape(1, 1, Cin, Cm), (1, 1), 'VALID',
            dimension_numbers=dn)
        e = jnp.clip(e * params['expand_scale'].reshape(1, 1, 1, Cm)
                     + params['expand_bias'].reshape(1, 1, 1, Cm), 0.0, 6.0)
    else:
        e = x
    pad = ((0, 0), (0, 1), (0, 1), (0, 0)) if stride == 2 \
        else ((0, 0), (1, 1), (1, 1), (0, 0))
    e = jnp.pad(e, pad)
    d = jax.lax.conv_general_dilated(
        e, params['w_dw'].reshape(3, 3, 1, Cm), (stride, stride), 'VALID',
        dimension_numbers=dn, feature_group_count=Cm)
    d = jnp.clip(d * params['dw_scale'].reshape(1, 1, 1, Cm)
                 + params['dw_bias'].reshape(1, 1, 1, Cm), 0.0, 6.0)
    o = jax.lax.conv_general_dilated(
        d, params['w_proj'].reshape(1, 1, Cm, Cout), (1, 1), 'VALID',
        dimension_numbers=dn)
    o = o * params['proj_scale'].reshape(1, 1, 1, Cout) \
        + params['proj_bias'].reshape(1, 1, 1, Cout)
    if Cin == Cout and stride == 1:
        o = o + x
    return jnp.transpose(o, (0, 3, 1, 2))


if __name__ == "__main__":
    key = jax.random.PRNGKey(0)

    cases = [
        # (N, Cin, H, W, Cout, stride, expansion_ratio)
        (2, 8, 16, 16, 8, 1, 4),     # expand + residual            (stride 1)
        (2, 8, 16, 16, 16, 2, 4),    # expand, no residual          (stride 2)
        (2, 8, 16, 16, 8, 1, 1),     # no expand conv + residual    (ratio 1)
    ]
    for (N, Cin, H, W, Cout, stride, ratio) in cases:
        key, kx, kp = jax.random.split(key, 3)
        x = jax.random.normal(kx, (N, Cin, H, W), dtype=jnp.float32)
        params = init_params(kp, Cin, Cout, ratio)

        out = inverted_residual_bottleneck(
            x, params, stride=stride, expansion_ratio=ratio)
        out = jax.block_until_ready(out)

        ref = reference(x, params, stride=stride, expansion_ratio=ratio)
        assert out.shape == ref.shape, (out.shape, ref.shape)
        max_err = float(jnp.max(jnp.abs(out - ref)))
        # bf16 MXU operands (f32 accumulation) vs. the pure-f32 reference.
        assert max_err < 3e-2, \
            f"case={(N, Cin, H, W, Cout, stride, ratio)} max_err={max_err}"
    print("KERNEL_OK")
</pallas_src>

<mosaic_0001>
module attributes {stable_mosaic.version = 11 : i64} {
  func.func @_bottleneck_kernel(%arg0: i32, %arg1: memref<1x8x256xf32, #tpu.memory_space<vmem>>, %arg2: memref<32x8xbf16, #tpu.memory_space<vmem>>, %arg3: memref<32x1xf32, #tpu.memory_space<vmem>>, %arg4: memref<32x9xf32, #tpu.memory_space<vmem>>, %arg5: memref<32x1xf32, #tpu.memory_space<vmem>>, %arg6: memref<8x32xbf16, #tpu.memory_space<vmem>>, %arg7: memref<8x1xf32, #tpu.memory_space<vmem>>, %arg8: memref<1x256xi32, #tpu.memory_space<vmem>>, %arg9: memref<1x8x256xf32, #tpu.memory_space<vmem>>) attributes {dimension_semantics = [#tpu.dimension_semantics<parallel>], iteration_bounds = array<i64: 2>, scalar_prefetch = 0 : i64, scratch_operands = 0 : i64, tpu.core_type = #tpu.core_type<tc>, window_params = [{transform_indices = @transform_0, window_bounds = array<i64: 1, 8, 256>}, {pipeline_mode = #tpu.pipeline_mode<synchronous>, transform_indices = @transform_1, window_bounds = array<i64: 32, 8>}, {pipeline_mode = #tpu.pipeline_mode<synchronous>, transform_indices = @transform_2, window_bounds = array<i64: 32, 1>}, {pipeline_mode = #tpu.pipeline_mode<synchronous>, transform_indices = @transform_3, window_bounds = array<i64: 32, 9>}, {pipeline_mode = #tpu.pipeline_mode<synchronous>, transform_indices = @transform_4, window_bounds = array<i64: 32, 1>}, {pipeline_mode = #tpu.pipeline_mode<synchronous>, transform_indices = @transform_5, window_bounds = array<i64: 8, 32>}, {pipeline_mode = #tpu.pipeline_mode<synchronous>, transform_indices = @transform_6, window_bounds = array<i64: 8, 1>}, {pipeline_mode = #tpu.pipeline_mode<synchronous>, transform_indices = @transform_7, window_bounds = array<i64: 1, 256>}, {transform_indices = @transform_8, window_bounds = array<i64: 1, 8, 256>}]} {
    %c0 = arith.constant 0 : index
    %c0_0 = arith.constant 0 : index
    %c0_1 = arith.constant 0 : index
    %0 = vector.load %arg1[%c0, %c0_0, %c0_1] : memref<1x8x256xf32, #tpu.memory_space<vmem>>, vector<1x8x256xf32>
    %1 = vector.shape_cast %0 : vector<1x8x256xf32> to vector<8x256xf32>
    %c0_2 = arith.constant 0 : index
    %c0_3 = arith.constant 0 : index
    %2 = vector.load %arg2[%c0_2, %c0_3] : memref<32x8xbf16, #tpu.memory_space<vmem>>, vector<32x8xbf16>
    %3 = arith.truncf %1 : vector<8x256xf32> to vector<8x256xbf16>
    %cst = arith.constant dense<0.000000e+00> : vector<32x256xf32>
    %4 = tpu.matmul %2, %3, %cst {dimension_numbers = #tpu.dot_dimension_numbers<[1], [0], [0], [1], [0, 0, 1, 1], [], []>} : vector<32x8xbf16>, vector<8x256xbf16>, vector<32x256xf32> -> vector<32x256xf32>
    %c0_4 = arith.constant 0 : index
    %c0_5 = arith.constant 0 : index
    %5 = vector.load %arg3[%c0_4, %c0_5] : memref<32x1xf32, #tpu.memory_space<vmem>>, vector<32x1xf32>
    %6 = vector.broadcast %5 : vector<32x1xf32> to vector<32x256xf32>
    %7 = arith.addf %4, %6 : vector<32x256xf32>
    %cst_6 = arith.constant 0.000000e+00 : f32
    %cst_7 = arith.constant 6.000000e+00 : f32
    %8 = vector.broadcast %cst_6 : f32 to vector<32x256xf32>
    %9 = arith.maximumf %8, %7 : vector<32x256xf32>
    %10 = vector.broadcast %cst_7 : f32 to vector<32x256xf32>
    %11 = arith.minimumf %10, %9 : vector<32x256xf32>
    %12 = tpu.iota {dimensions = array<i32: 1>} : vector<1x256xi32>
    %c0_8 = arith.constant 0 : index
    %c0_9 = arith.constant 0 : index
    %13 = vector.load %arg8[%c0_8, %c0_9] : memref<1x256xi32, #tpu.memory_space<vmem>>, vector<1x256xi32>
    %cst_10 = arith.constant 0.000000e+00 : f32
    %14 = vector.broadcast %cst_10 : f32 to vector<32x256xf32>
    %c17_i32 = arith.constant 17 : i32
    %15 = tpu.dynamic_rotate %11 by %c17_i32 dim 1 : vector<32x256xf32>, i32 -> vector<32x256xf32>
    %c16_i32 = arith.constant 16 : i32
    %16 = vector.broadcast %c16_i32 : i32 to vector<1x256xi32>
    %17 = arith.cmpi sge, %12, %16 : vector<1x256xi32>
    %c1_i32 = arith.constant 1 : i32
    %18 = vector.broadcast %c1_i32 : i32 to vector<1x256xi32>
    %19 = arith.cmpi sge, %13, %18 : vector<1x256xi32>
    %20 = arith.andi %17, %19 : vector<1x256xi1>
    %cst_11 = arith.constant 0.000000e+00 : f32
    %21 = vector.shape_cast %20 : vector<1x256xi1> to vector<1x256xi1>
    %22 = vector.broadcast %21 : vector<1x256xi1> to vector<32x256xi1>
    %23 = vector.broadcast %cst_11 : f32 to vector<32x256xf32>
    %24 = arith.select %22, %15, %23 : vector<32x256xi1>, vector<32x256xf32>
    %c0_12 = arith.constant 0 : index
    %c0_13 = arith.constant 0 : index
    %25 = vector.load %arg4[%c0_12, %c0_13] : memref<32x9xf32, #tpu.memory_space<vmem>>, vector<32x1xf32>
    %26 = vector.broadcast %25 : vector<32x1xf32> to vector<32x256xf32>
    %27 = arith.mulf %24, %26 : vector<32x256xf32>
    %28 = arith.addf %14, %27 : vector<32x256xf32>
    %c16_i32_14 = arith.constant 16 : i32
    %29 = tpu.dynamic_rotate %11 by %c16_i32_14 dim 1 : vector<32x256xf32>, i32 -> vector<32x256xf32>
    %c16_i32_15 = arith.constant 16 : i32
    %30 = vector.broadcast %c16_i32_15 : i32 to vector<1x256xi32>
    %31 = arith.cmpi sge, %12, %30 : vector<1x256xi32>
    %cst_16 = arith.constant 0.000000e+00 : f32
    %32 = vector.shape_cast %31 : vector<1x256xi1> to vector<1x256xi1>
    %33 = vector.broadcast %32 : vector<1x256xi1> to vector<32x256xi1>
    %34 = vector.broadcast %cst_16 : f32 to vector<32x256xf32>
    %35 = arith.select %33, %29, %34 : vector<32x256xi1>, vector<32x256xf32>
    %c0_17 = arith.constant 0 : index
    %c1 = arith.constant 1 : index
    %36 = vector.load %arg4[%c0_17, %c1] : memref<32x9xf32, #tpu.memory_space<vmem>>, vector<32x1xf32>
    %37 = vector.broadcast %36 : vector<32x1xf32> to vector<32x256xf32>
    %38 = arith.mulf %35, %37 : vector<32x256xf32>
    %39 = arith.addf %28, %38 : vector<32x256xf32>
    %c15_i32 = arith.constant 15 : i32
    %40 = tpu.dynamic_rotate %11 by %c15_i32 dim 1 : vector<32x256xf32>, i32 -> vector<32x256xf32>
    %c16_i32_18 = arith.constant 16 : i32
    %41 = vector.broadcast %c16_i32_18 : i32 to vector<1x256xi32>
    %42 = arith.cmpi sge, %12, %41 : vector<1x256xi32>
    %c15_i32_19 = arith.constant 15 : i32
    %43 = vector.broadcast %c15_i32_19 : i32 to vector<1x256xi32>
    %44 = arith.cmpi slt, %13, %43 : vector<1x256xi32>
    %45 = arith.andi %42, %44 : vector<1x256xi1>
    %cst_20 = arith.constant 0.000000e+00 : f32
    %46 = vector.shape_cast %45 : vector<1x256xi1> to vector<1x256xi1>
    %47 = vector.broadcast %46 : vector<1x256xi1> to vector<32x256xi1>
    %48 = vector.broadcast %cst_20 : f32 to vector<32x256xf32>
    %49 = arith.select %47, %40, %48 : vector<32x256xi1>, vector<32x256xf32>
    %c0_21 = arith.constant 0 : index
    %c2 = arith.constant 2 : index
    %50 = vector.load %arg4[%c0_21, %c2] : memref<32x9xf32, #tpu.memory_space<vmem>>, vector<32x1xf32>
    %51 = vector.broadcast %50 : vector<32x1xf32> to vector<32x256xf32>
    %52 = arith.mulf %49, %51 : vector<32x256xf32>
    %53 = arith.addf %39, %52 : vector<32x256xf32>
    %c1_i32_22 = arith.constant 1 : i32
    %54 = tpu.dynamic_rotate %11 by %c1_i32_22 dim 1 : vector<32x256xf32>, i32 -> vector<32x256xf32>
    %c1_i32_23 = arith.constant 1 : i32
    %55 = vector.broadcast %c1_i32_23 : i32 to vector<1x256xi32>
    %56 = arith.cmpi sge, %13, %55 : vector<1x256xi32>
    %cst_24 = arith.constant 0.000000e+00 : f32
    %57 = vector.shape_cast %56 : vector<1x256xi1> to vector<1x256xi1>
    %58 = vector.broadcast %57 : vector<1x256xi1> to vector<32x256xi1>
    %59 = vector.broadcast %cst_24 : f32 to vector<32x256xf32>
    %60 = arith.select %58, %54, %59 : vector<32x256xi1>, vector<32x256xf32>
    %c0_25 = arith.constant 0 : index
    %c3 = arith.constant 3 : index
    %61 = vector.load %arg4[%c0_25, %c3] : memref<32x9xf32, #tpu.memory_space<vmem>>, vector<32x1xf32>
    %62 = vector.broadcast %61 : vector<32x1xf32> to vector<32x256xf32>
    %63 = arith.mulf %60, %62 : vector<32x256xf32>
    %64 = arith.addf %53, %63 : vector<32x256xf32>
    %c0_26 = arith.constant 0 : index
    %c4 = arith.constant 4 : index
    %65 = vector.load %arg4[%c0_26, %c4] : memref<32x9xf32, #tpu.memory_space<vmem>>, vector<32x1xf32>
    %66 = vector.broadcast %65 : vector<32x1xf32> to vector<32x256xf32>
    %67 = arith.mulf %11, %66 : vector<32x256xf32>
    %68 = arith.addf %64, %67 : vector<32x256xf32>
    %c255_i32 = arith.constant 255 : i32
    %69 = tpu.dynamic_rotate %11 by %c255_i32 dim 1 : vector<32x256xf32>, i32 -> vector<32x256xf32>
    %c15_i32_27 = arith.constant 15 : i32
    %70 = vector.broadcast %c15_i32_27 : i32 to vector<1x256xi32>
    %71 = arith.cmpi slt, %13, %70 : vector<1x256xi32>
    %cst_28 = arith.constant 0.000000e+00 : f32
    %72 = vector.shape_cast %71 : vector<1x256xi1> to vector<1x256xi1>
    %73 = vector.broadcast %72 : vector<1x256xi1> to vector<32x256xi1>
    %74 = vector.broadcast %cst_28 : f32 to vector<32x256xf32>
    %75 = arith.select %73, %69, %74 : vector<32x256xi1>, vector<32x256xf32>
    %c0_29 = arith.constant 0 : index
    %c5 = arith.constant 5 : index
    %76 = vector.load %arg4[%c0_29, %c5] : memref<32x9xf32, #tpu.memory_space<vmem>>, vector<32x1xf32>
    %77 = vector.broadcast %76 : vector<32x1xf32> to vector<32x256xf32>
    %78 = arith.mulf %75, %77 : vector<32x256xf32>
    %79 = arith.addf %68, %78 : vector<32x256xf32>
    %c241_i32 = arith.constant 241 : i32
    %80 = tpu.dynamic_rotate %11 by %c241_i32 dim 1 : vector<32x256xf32>, i32 -> vector<32x256xf32>
    %c240_i32 = arith.constant 240 : i32
    %81 = vector.broadcast %c240_i32 : i32 to vector<1x256xi32>
    %82 = arith.cmpi slt, %12, %81 : vector<1x256xi32>
    %c1_i32_30 = arith.constant 1 : i32
    %83 = vector.broadcast %c1_i32_30 : i32 to vector<1x256xi32>
    %84 = arith.cmpi sge, %13, %83 : vector<1x256xi32>
    %85 = arith.andi %82, %84 : vector<1x256xi1>
    %cst_31 = arith.constant 0.000000e+00 : f32
    %86 = vector.shape_cast %85 : vector<1x256xi1> to vector<1x256xi1>
    %87 = vector.broadcast %86 : vector<1x256xi1> to vector<32x256xi1>
    %88 = vector.broadcast %cst_31 : f32 to vector<32x256xf32>
    %89 = arith.select %87, %80, %88 : vector<32x256xi1>, vector<32x256xf32>
    %c0_32 = arith.constant 0 : index
    %c6 = arith.constant 6 : index
    %90 = vector.load %arg4[%c0_32, %c6] : memref<32x9xf32, #tpu.memory_space<vmem>>, vector<32x1xf32>
    %91 = vector.broadcast %90 : vector<32x1xf32> to vector<32x256xf32>
    %92 = arith.mulf %89, %91 : vector<32x256xf32>
    %93 = arith.addf %79, %92 : vector<32x256xf32>
    %c240_i32_33 = arith.constant 240 : i32
    %94 = tpu.dynamic_rotate %11 by %c240_i32_33 dim 1 : vector<32x256xf32>, i32 -> vector<32x256xf32>
    %c240_i32_34 = arith.constant 240 : i32
    %95 = vector.broadcast %c240_i32_34 : i32 to vector<1x256xi32>
    %96 = arith.cmpi slt, %12, %95 : vector<1x256xi32>
    %cst_35 = arith.constant 0.000000e+00 : f32
    %97 = vector.shape_cast %96 : vector<1x256xi1> to vector<1x256xi1>
    %98 = vector.broadcast %97 : vector<1x256xi1> to vector<32x256xi1>
    %99 = vector.broadcast %cst_35 : f32 to vector<32x256xf32>
    %100 = arith.select %98, %94, %99 : vector<32x256xi1>, vector<32x256xf32>
    %c0_36 = arith.constant 0 : index
    %c7 = arith.constant 7 : index
    %101 = vector.load %arg4[%c0_36, %c7] : memref<32x9xf32, #tpu.memory_space<vmem>>, vector<32x1xf32>
    %102 = vector.broadcast %101 : vector<32x1xf32> to vector<32x256xf32>
    %103 = arith.mulf %100, %102 : vector<32x256xf32>
    %104 = arith.addf %93, %103 : vector<32x256xf32>
    %c239_i32 = arith.constant 239 : i32
    %105 = tpu.dynamic_rotate %11 by %c239_i32 dim 1 : vector<32x256xf32>, i32 -> vector<32x256xf32>
    %c240_i32_37 = arith.constant 240 : i32
    %106 = vector.broadcast %c240_i32_37 : i32 to vector<1x256xi32>
    %107 = arith.cmpi slt, %12, %106 : vector<1x256xi32>
    %c15_i32_38 = arith.constant 15 : i32
    %108 = vector.broadcast %c15_i32_38 : i32 to vector<1x256xi32>
    %109 = arith.cmpi slt, %13, %108 : vector<1x256xi32>
    %110 = arith.andi %107, %109 : vector<1x256xi1>
    %cst_39 = arith.constant 0.000000e+00 : f32
    %111 = vector.shape_cast %110 : vector<1x256xi1> to vector<1x256xi1>
    %112 = vector.broadcast %111 : vector<1x256xi1> to vector<32x256xi1>
    %113 = vector.broadcast %cst_39 : f32 to vector<32x256xf32>
    %114 = arith.select %112, %105, %113 : vector<32x256xi1>, vector<32x256xf32>
    %c0_40 = arith.constant 0 : index
    %c8 = arith.constant 8 : index
    %115 = vector.load %arg4[%c0_40, %c8] : memref<32x9xf32, #tpu.memory_space<vmem>>, vector<32x1xf32>
    %116 = vector.broadcast %115 : vector<32x1xf32> to vector<32x256xf32>
    %117 = arith.mulf %114, %116 : vector<32x256xf32>
    %118 = arith.addf %104, %117 : vector<32x256xf32>
    %c0_41 = arith.constant 0 : index
    %c0_42 = arith.constant 0 : index
    %119 = vector.load %arg5[%c0_41, %c0_42] : memref<32x1xf32, #tpu.memory_space<vmem>>, vector<32x1xf32>
    %120 = vector.broadcast %119 : vector<32x1xf32> to vector<32x256xf32>
    %121 = arith.addf %118, %120 : vector<32x256xf32>
    %cst_43 = arith.constant 0.000000e+00 : f32
    %cst_44 = arith.constant 6.000000e+00 : f32
    %122 = vector.broadcast %cst_43 : f32 to vector<32x256xf32>
    %123 = arith.maximumf %122, %121 : vector<32x256xf32>
    %124 = vector.broadcast %cst_44 : f32 to vector<32x256xf32>
    %125 = arith.minimumf %124, %123 : vector<32x256xf32>
    %c0_45 = arith.constant 0 : index
    %c0_46 = arith.constant 0 : index
    %126 = vector.load %arg6[%c0_45, %c0_46] : memref<8x32xbf16, #tpu.memory_space<vmem>>, vector<8x32xbf16>
    %127 = arith.truncf %125 : vector<32x256xf32> to vector<32x256xbf16>
    %cst_47 = arith.constant dense<0.000000e+00> : vector<8x256xf32>
    %128 = tpu.matmul %126, %127, %cst_47 {dimension_numbers = #tpu.dot_dimension_numbers<[1], [0], [0], [1], [0, 0, 1, 1], [], []>} : vector<8x32xbf16>, vector<32x256xbf16>, vector<8x256xf32> -> vector<8x256xf32>
    %c0_48 = arith.constant 0 : index
    %c0_49 = arith.constant 0 : index
    %129 = vector.load %arg7[%c0_48, %c0_49] : memref<8x1xf32, #tpu.memory_space<vmem>>, vector<8x1xf32>
    %130 = vector.broadcast %129 : vector<8x1xf32> to vector<8x256xf32>
    %131 = arith.addf %128, %130 : vector<8x256xf32>
    %132 = arith.addf %131, %1 : vector<8x256xf32>
    %c0_50 = arith.constant 0 : index
    %c0_51 = arith.constant 0 : index
    %c0_52 = arith.constant 0 : index
    %133 = vector.load %arg9[%c0_50, %c0_51, %c0_52] : memref<1x8x256xf32, #tpu.memory_space<vmem>>, vector<1x8x256xf32>
    %134 = vector.shape_cast %133 : vector<1x8x256xf32> to vector<8x256xf32>
    %135 = vector.shape_cast %132 : vector<8x256xf32> to vector<1x8x256xf32>
    tpu.vector_store %arg9[%c0_50, %c0_51, %c0_52], %135 {strides = array<i32>} : memref<1x8x256xf32, #tpu.memory_space<vmem>>, vector<1x8x256xf32>,
    return
  }
  func.func @transform_0(%arg0: i32) -> (i32, i32, i32) {
    %c0_i32 = arith.constant 0 : i32
    %c0_i32_0 = arith.constant 0 : i32
    %c0_i32_1 = arith.constant 0 : i32
    return %arg0, %c0_i32, %c0_i32_0 : i32, i32, i32
  }
  func.func @transform_1(%arg0: i32) -> (i32, i32) {
    %c0_i32 = arith.constant 0 : i32
    %c0_i32_0 = arith.constant 0 : i32
    %c0_i32_1 = arith.constant 0 : i32
    return %c0_i32, %c0_i32_0 : i32, i32
  }
  func.func @transform_2(%arg0: i32) -> (i32, i32) {
    %c0_i32 = arith.constant 0 : i32
    %c0_i32_0 = arith.constant 0 : i32
    %c0_i32_1 = arith.constant 0 : i32
    return %c0_i32, %c0_i32_0 : i32, i32
  }
  func.func @transform_3(%arg0: i32) -> (i32, i32) {
    %c0_i32 = arith.constant 0 : i32
    %c0_i32_0 = arith.constant 0 : i32
    %c0_i32_1 = arith.constant 0 : i32
    return %c0_i32, %c0_i32_0 : i32, i32
  }
  func.func @transform_4(%arg0: i32) -> (i32, i32) {
    %c0_i32 = arith.constant 0 : i32
    %c0_i32_0 = arith.constant 0 : i32
    %c0_i32_1 = arith.constant 0 : i32
    return %c0_i32, %c0_i32_0 : i32, i32
  }
  func.func @transform_5(%arg0: i32) -> (i32, i32) {
    %c0_i32 = arith.constant 0 : i32
    %c0_i32_0 = arith.constant 0 : i32
    %c0_i32_1 = arith.constant 0 : i32
    return %c0_i32, %c0_i32_0 : i32, i32
  }
  func.func @transform_6(%arg0: i32) -> (i32, i32) {
    %c0_i32 = arith.constant 0 : i32
    %c0_i32_0 = arith.constant 0 : i32
    %c0_i32_1 = arith.constant 0 : i32
    return %c0_i32, %c0_i32_0 : i32, i32
  }
  func.func @transform_7(%arg0: i32) -> (i32, i32) {
    %c0_i32 = arith.constant 0 : i32
    %c0_i32_0 = arith.constant 0 : i32
    %c0_i32_1 = arith.constant 0 : i32
    return %c0_i32, %c0_i32_0 : i32, i32
  }
  func.func @transform_8(%arg0: i32) -> (i32, i32, i32) {
    %c0_i32 = arith.constant 0 : i32
    %c0_i32_0 = arith.constant 0 : i32
    %c0_i32_1 = arith.constant 0 : i32
    return %arg0, %c0_i32, %c0_i32_0 : i32, i32, i32
  }
}

</mosaic_0001>

<bundles_post_ra>
// kernel: tpu_custom_call.1
= control target key start
LH: loop header
LB: loop body
LE: loop exit
PB: predicated region body
PF: predicated region fallthrough
CT: control target
= control target key end

     0   :  { %13 = vsyncpa [#allocation3], 0  ;;  %s2512_s0 = inlined_call_operand.vmem [shape: f32[2,8,256], index: 0, kind: input, shape index: {}]   ;;  %s2513_s1 = inlined_call_operand.vmem [shape: bf16[32,8], index: 1, kind: input, shape index: {}]   ;;  %s2514_s2 = inlined_call_operand.vmem [shape: f32[32,1], index: 2, kind: input, shape index: {}]   ;;  %s2515_s3 = inlined_call_operand.vmem [shape: f32[32,9], index: 3, kind: input, shape index: {}]   ;;  %s2516_s4 = inlined_call_operand.vmem [shape: f32[32,1], index: 4, kind: input, shape index: {}]   ;;  %s2517_s5 = inlined_call_operand.vmem [shape: bf16[8,32], index: 5, kind: input, shape index: {}]   ;;  %s2518_s6 = inlined_call_operand.vmem [shape: f32[8,1], index: 6, kind: input, shape index: {}]   ;;  %s2519_s7 = inlined_call_operand.vmem [shape: s32[1,256], index: 7, kind: input, shape index: {}]   ;;  %s2520_s8 = inlined_call_operand.hbm [shape: f32[2,8,256], index: 8, kind: output, shape index: {}]  }
   0x1   :  { %15 = vsyncpa [#allocation3 + $0x1], 0  ;;  %s1507_s27 = smov 0   ;;  %s1509_s28 = smov 0  }
   0x2   :  { %s1511_s29 = smov 0   ;;  %s1513_s30 = smov 0  }
   0x3 LB: > { %s1528_s9 = sadd.s32 4294967295, %s1442_s30   ;;  %s1272_s10 = sadd.s32 4294967294, %s1442_s30   ;;  %s1442_s30 = sphi %s1513_s30, %s2655_s30   ;;  %s1438_s29 = sphi %s1511_s29, %s2654_s29   ;;  %s1434_s28 = sphi %s1509_s28, %s2653_s28   ;;  %s1430_s27 = sphi %s1507_s27, %s2652_s27  }
   0x4   : > { %s1532_s11 = sadd.s32 1, %s1442_s30   ;;  %s201_s12 = sadd.s32 1, %s1438_s29 }
   0x5   : > { %s198_s13 = ssub.s32 %s1442_s30, %s1532_s11  ;;  %p211_p0 = scmp.ne.s32.totalorder %s1438_s29, %s1434_s28 }
   0x6   : > { %p199_p1 = scmp.eq.s32.totalorder %s198_s13, 0  ;;  %p212_p2 = scmp.eq.s32.totalorder %s1528_s9, 1 }
   0x7   : > { %p217_p3 = scmp.ne.s32.totalorder %s1434_s28, %s1430_s27  ;;  %p218_p4 = scmp.eq.s32.totalorder %s1272_s10, 1 }
   0x8   : > { %s1543_s14 = scalar_select %p199_p1, %s1438_s29, %s201_s12  }
   0x9   : > { %p1545_p5 = por %p212_p2, %p211_p0  ;;  %p1549_p6 = por %p218_p4, %p217_p3 }
   0xa   : > { %p1275_p7 = scmp.ge.s32.totalorder %s1442_s30, 1  ;;  %p265_p8 = scmp.lt.s32.totalorder %s1442_s30, 3 }
   0xc   : > { %p266_p9 = pnand %p1275_p7, %p265_p8 }
   0xe   : > { %269 = sbr.rel (%p266_p9) target bundleno = 764 (0x2fc), region = 52 }
  0x15   : > { %p299_p10 = scmp.lt.s32.totalorder %s1528_s9, 1  ;;  %v1559_v0 = vld [vmem:[%s2515_s3] sm:$0xff]  ;;  %v1444_v1 = vmov 1   ;;  %v2521_v2 = vmov 0   ;;  %v1568_v3 = vld [vmem:[%s2515_s3 + $0x10] sm:$0xff]  ;;  %v316_v5 = vld [vmem:[%s2514_s2 + $0x18] sm:$0xff] }
  0x16   : > { %1349 = vset.pattern.permute.xlu0 %v1444_v1  ;;  %393 = vmatprep.mubr.bf16.mxu0 %v2521_v2  ;;  %v315_v4 = vld [vmem:[%s2514_s2 + $0x10] sm:$0xff]  ;;  %vm354_vm0 = vcmask 1043456   ;;  %v496_v10 = vld [vmem:[%s2515_s3 + $0x8] sm:$0xff]  ;;  %v1376_v12 = vld [vmem:[%s2513_s1] sm:$0xff]   ;;  %vm347_vm1 = vcmask 64512   ;;  %v1446_v13 = vmov 2  }
  0x17   : > { %s300_s19 = scalar_select %p299_p10, %s1528_s9, 1  ;;  %573 = vperm.xlu0 %1349, %v1559_v0   ;;  %1348 = vset.pattern.permute.xlu1 %v2521_v2  ;;  %v1377_v14 = vld [vmem:[%s2513_s1 + $0x8] sm:$0xff]   ;;  %v1447_v15 = vmov 3   ;;  %v1448_v16 = vmov 4   ;;  %v498_v17 = vld [vmem:[%s2515_s3 + $0x18] sm:$0xff]  ;;  %v1449_v18 = vmov 5  }
  0x18   : > { %1185 = vmatprep.mubr.bf16.mxu1 %v2521_v2  ;;  %329 = vperm.xlu1 %1348, %v315_v4   ;;  %v1450_v19 = vmov 6   ;;  %v1451_v20 = vmov 7   ;;  %v1452_v21 = vmov 8   ;;  %v313_v22 = vld [vmem:[%s2514_s2] sm:$0xff]  ;;  %v314_v23 = vld [vmem:[%s2514_s2 + $0x8] sm:$0xff]  ;;  %v1092_v24 = vld [vmem:[%s2516_s4 + $0x10] sm:$0xff] }
  0x19   : > { %s1290_s24 = sshll.u32 %s300_s19, 4  ;;  %v1090_v25 = vld [vmem:[%s2516_s4] sm:$0xff]  ;;  %v1091_v26 = vld [vmem:[%s2516_s4 + $0x8] sm:$0xff]  ;;  %v1093_v27 = vld [vmem:[%s2516_s4 + $0x18] sm:$0xff]  ;;  %s1453_s25 = smov 16  }
  0x1a   : > { %s1577_s10 = scalar_lea.vmem %s2512_s0, %s1290_s24  ;;  %s1454_s26 = smov 17  }
  0x1b   : > { %v306_v6 = vld [vmem:[%s1577_s10 + $0x8] sm:$0xff]  ;;  %v305_v7 = vld [vmem:[%s1577_s10] sm:$0xff]  ;;  %581 = vperm.xlu0 %1349, %v1568_v3   ;;  %s1455_s12 = smov 1   ;;  %s1456_s13 = smov 15  }
  0x1c   : > { %v312_v8 = vpack.c.bf16 %v306_v6, %v306_v6  ;;  %v311_v9 = vpack.c.bf16 %v305_v7, %v305_v7  ;;  %334 = vperm.xlu1 %1348, %v316_v5   ;;  %s1457_s17 = smov 127   ;;  %s1458_s18 = smov 113  }
  0x1d   : > { %s1459_s19 = smov 111   ;;  %s1460_s20 = smov 112  }
  0x1e   : > { %1281 = vmatprep.subr.msk.bf16.mxu0 %vm354_vm0, %v312_v8  ;;  %v356_v11 = vsel %vm354_vm0, %v311_v9, 0 }
  0x1f   : > { %362 = vmatpush1.bf16.msra.mxu0 %v356_v11  ;;  %1353 = vset.pattern.permute.xlu0 %v1446_v13 }
  0x20   : > { %668 = vperm.xlu0 %1353, %v496_v10   ;;  %506 = vperm.xlu1 %1348, %v496_v10  }
  0x22   : > { %1282 = vmatmul.mubr.msk.bf16.vlgmr.msra.gmra.mrb[0].mxu0 %vm347_vm1, %v1376_v12 }
  0x23   : > { %403 = vmatprep.mubr.bf16.mxu0 %v2521_v2 }
  0x24   : > { %672 = vperm.xlu0 %1353, %v1568_v3   ;;  %1350 = vset.pattern.permute.xlu1 %v1444_v1 }
  0x25   : > { %577 = vperm.xlu1 %1350, %v496_v10  }
  0x28   : > { %1356 = vset.pattern.permute.xlu0 %v1447_v15 }
  0x29   : > { %735 = vperm.xlu0 %1356, %v496_v10   ;;  %1351 = vset.pattern.permute.xlu1 %v1446_v13 }
  0x2a   : > { %1283 = vmatmul.mubr.msk.bf16.gmra.mrb[4].mxu0 %vm347_vm1, %v1377_v14  ;;  %664 = vperm.xlu1 %1351, %v1559_v0  }
  0x2d   : > { %739 = vperm.xlu0 %1356, %v1568_v3  }
  0x2e   : > { %1352 = vset.pattern.permute.xlu1 %v2521_v2 }
  0x2f   : > { %511 = vperm.xlu1 %1352, %v1568_v3  }
  0x31   : > { %1359 = vset.pattern.permute.xlu0 %v1448_v16 }
  0x32   : > { %767 = vperm.xlu0 %1359, %v496_v10  }
  0x33   : > { %516 = vperm.xlu1 %1352, %v498_v17  }
  0x36   : > { %771 = vperm.xlu0 %1359, %v1568_v3  }
  0x37   : > { %1354 = vset.pattern.permute.xlu1 %v1444_v1 }
  0x38   : > { %585 = vperm.xlu1 %1354, %v498_v17  }
  0x3a   : > { %1362 = vset.pattern.permute.xlu0 %v1449_v18 }
  0x3b   : > { %834 = vperm.xlu0 %1362, %v496_v10  }
  0x3c   : > { %1355 = vset.pattern.permute.xlu1 %v1447_v15 }
  0x3d   : > { %731 = vperm.xlu1 %1355, %v1559_v0  }
  0x3f   : > { %838 = vperm.xlu0 %1362, %v1568_v3  }
  0x41   : > { %1357 = vset.pattern.permute.xlu1 %v1446_v13 }
  0x42   : > { %676 = vperm.xlu1 %1357, %v498_v17  }
  0x43   : > { %1365 = vset.pattern.permute.xlu0 %v1450_v19 }
  0x44   : > { %915 = vperm.xlu0 %1365, %v496_v10  }
  0x46   : > { %1358 = vset.pattern.permute.xlu1 %v1448_v16 }
  0x47   : > { %763 = vperm.xlu1 %1358, %v1559_v0  }
  0x48   : > { %919 = vperm.xlu0 %1365, %v1568_v3  }
  0x4b   : > { %1360 = vset.pattern.permute.xlu1 %v1447_v15 }
  0x4c   : > { %1368 = vset.pattern.permute.xlu0 %v1451_v20  ;;  %743 = vperm.xlu1 %1360, %v498_v17  }
  0x4d   : > { %984 = vperm.xlu0 %1368, %v496_v10  }
  0x50   : > { %1361 = vset.pattern.permute.xlu1 %v1449_v18 }
  0x51   : > { %988 = vperm.xlu0 %1368, %v1568_v3   ;;  %830 = vperm.xlu1 %1361, %v1559_v0  }
  0x55   : > { %1371 = vset.pattern.permute.xlu0 %v1452_v21  ;;  %1363 = vset.pattern.permute.xlu1 %v1448_v16 }
  0x56   : > { %1063 = vperm.xlu0 %1371, %v496_v10   ;;  %775 = vperm.xlu1 %1363, %v498_v17  }
  0x5a   : > { %1071 = vperm.xlu0 %1371, %v498_v17   ;;  %1364 = vset.pattern.permute.xlu1 %v1450_v19 }
  0x5b   : > { %911 = vperm.xlu1 %1364, %v1559_v0  }
  0x5e   : > { %1374 = vset.pattern.permute.xlu0 %v2521_v2 }
  0x5f   : > { %319 = vperm.xlu0 %1374, %v313_v22   ;;  %1366 = vset.pattern.permute.xlu1 %v1449_v18 }
  0x60   : > { %842 = vperm.xlu1 %1366, %v498_v17  }
  0x63   : > { %324 = vperm.xlu0 %1374, %v314_v23  }
  0x64   : > { %1367 = vset.pattern.permute.xlu1 %v1451_v20 }
  0x65   : > { %980 = vperm.xlu1 %1367, %v1559_v0  }
  0x67   : > { %501 = vperm.xlu0 %1374, %v1559_v0  }
  0x69   : > { %1369 = vset.pattern.permute.xlu1 %v1450_v19 }
  0x6a   : > { %923 = vperm.xlu1 %1369, %v498_v17  }
  0x6b   : > { %1106 = vperm.xlu0 %1374, %v1092_v24  }
  0x6e   : > { %1370 = vset.pattern.permute.xlu1 %v1452_v21 }
  0x6f   : > { %1059 = vperm.xlu1 %1370, %v1559_v0  }
  0x73   : > { %1372 = vset.pattern.permute.xlu1 %v1451_v20 }
  0x74   : > { %992 = vperm.xlu1 %1372, %v498_v17  }
  0x78   : > { %1373 = vset.pattern.permute.xlu1 %v1452_v21 }
  0x79   : > { %1067 = vperm.xlu1 %1373, %v1568_v3  }
  0x7d   : > { %1375 = vset.pattern.permute.xlu1 %v2521_v2 }
  0x7e   : > { %1096 = vperm.xlu1 %1375, %v1090_v25  }
  0x82   : > { %1101 = vperm.xlu1 %1375, %v1091_v26  }
  0x86   : > { %1111 = vperm.xlu1 %1375, %v1093_v27  }
  0x96   : > { %v1635_v28 = vpop.permute.xlu0 %573 }
  0x97   : > { %v1661_v41 = vpop.permute.xlu1 %329 }
  0x9a   : > { %v1637_v29 = vpop.permute.xlu0 %581 }
  0x9b   : > { %2556 = vst [vmem:[#allocation5_spill] sm:$0xff] %v1637_v29  ;;  %v1665_v43 = vpop.permute.xlu1 %334 }
  0x9f   : > { %v1639_v30 = vpop.permute.xlu0 %668  ;;  %v1669_v45 = vpop.permute.xlu1 %506 }
  0xa3   : > { %v1641_v31 = vpop.permute.xlu0 %672 }
  0xa4   : > { %2557 = vst [vmem:[#allocation6_spill] sm:$0xff] %v1641_v31  ;;  %v1673_v47 = vpop.permute.xlu1 %577 }
  0xa8   : > { %v1643_v32 = vpop.permute.xlu0 %735 }
  0xa9   : > { %v1675_v55 = vpop.permute.xlu1 %664 }
  0xac   : > { %v1645_v33 = vpop.permute.xlu0 %739 }
  0xad   : > { %2558 = vst [vmem:[#allocation7_spill] sm:$0xff] %v1645_v33 }
  0xae   : > { %v1685_v60 = vpop.permute.xlu1 %511 }
  0xb1   : > { %v1647_v34 = vpop.permute.xlu0 %767 }
  0xb2   : > { %v1697_v0 = vpop.permute.xlu1 %516 }
  0xb3   : > { %2563 = vst [vmem:[#allocation12_spill] sm:$0xff] %v1697_v0 }
  0xb5   : > { %v1649_v35 = vpop.permute.xlu0 %771 }
  0xb7   : > { %v1705_v6 = vpop.permute.xlu1 %585 }
  0xb8   : > { %2564 = vst [vmem:[#allocation13_spill] sm:$0xff] %v1705_v6 }
  0xba   : > { %v1651_v36 = vpop.permute.xlu0 %834 }
  0xbc   : > { %v1717_v8 = vpop.permute.xlu1 %731 }
  0xbe   : > { %v1653_v37 = vpop.permute.xlu0 %838 }
  0xbf   : > { %2559 = vst [vmem:[#allocation8_spill] sm:$0xff] %v1653_v37 }
  0xc1   : > { %v1723_v9 = vpop.permute.xlu1 %676 }
  0xc2   : > { %2565 = vst [vmem:[#allocation14_spill] sm:$0xff] %v1723_v9 }
  0xc3   : > { %v1655_v38 = vpop.permute.xlu0 %915 }
  0xc6   : > { %v1733_v10 = vpop.permute.xlu1 %763 }
  0xc7   : > { %v1657_v39 = vpop.permute.xlu0 %919 }
  0xc8   : > { %2560 = vst [vmem:[#allocation9_spill] sm:$0xff] %v1657_v39 }
  0xcb   : > { %v1739_v12 = vpop.permute.xlu1 %743 }
  0xcc   : > { %v1659_v40 = vpop.permute.xlu0 %984  ;;  %2566 = vst [vmem:[#allocation15_spill] sm:$0xff] %v1739_v12 }
  0xd0   : > { %v1663_v42 = vpop.permute.xlu0 %988  ;;  %v1752_v17 = vpop.permute.xlu1 %830 }
  0xd1   : > { %2561 = vst [vmem:[#allocation10_spill] sm:$0xff] %v1663_v42 }
  0xd5   : > { %v1667_v44 = vpop.permute.xlu0 %1063  ;;  %v1760_v19 = vpop.permute.xlu1 %775 }
  0xd6   : > { %2567 = vst [vmem:[#allocation16_spill] sm:$0xff] %v1760_v19 }
  0xd9   : > { %v1671_v46 = vpop.permute.xlu0 %1071 }
  0xda   : > { %2562 = vst [vmem:[#allocation11_spill] sm:$0xff] %v1671_v46  ;;  %v1771_v21 = vpop.permute.xlu1 %911 }
  0xde   : > { %v320_v48 = vpop.permute.xlu0 %319 }
  0xdf   : > { %v1779_v24 = vpop.permute.xlu1 %842 }
  0xe0   : > { %2568 = vst [vmem:[#allocation17_spill] sm:$0xff] %v1779_v24 }
  0xe2   : > { %v325_v63 = vpop.permute.xlu0 %324 }
  0xe4   : > { %v1789_v25 = vpop.permute.xlu1 %980 }
  0xe9   : > { %v1795_v26 = vpop.permute.xlu1 %923 }
  0xea   : > { %2569 = vst [vmem:[#allocation18_spill] sm:$0xff] %v1795_v26 }
  0xf5   : > { %v395_v49 = vpop.f32.mrb[0].mxu0 }
  0xf6   : > { %v396_v50 = vadd.f32 %v395_v49, %v320_v48  ;;  %v397_v51 = vpop.f32.mrb[1].mxu0 }
  0xf7   : > { %v399_v52 = vpop.f32.mrb[2].mxu0  ;;  %v398_v62 = vadd.f32 %v397_v51, %v320_v48 }
  0xf8   : > { %v414_v53 = vmax.f32 %v396_v50, 0.0  ;;  %v401_v54 = vpop.f32.mrb[3].mxu0  ;;  %v400_v3 = vadd.f32 %v399_v52, %v325_v63 }
  0xf9   : > { %v415_v1 = vmax.f32 %v398_v62, 0.0  ;;  %v402_v11 = vadd.f32 %v401_v54, %v325_v63 }
  0xfa   : > { %v1677_v56 = vmin.f32 %v414_v53, 6.0  ;;  %v416_v5 = vmax.f32 %v400_v3, 0.0 }
  0xfb   : > { %v1703_v4 = vmin.f32 %v415_v1, 6.0  ;;  %v417_v13 = vmax.f32 %v402_v11, 0.0 }
  0xfc   : > { %535 = vrot.lane.b32.xlu0 %v1677_v56, %s1453_s25  ;;  %434 = vrot.lane.b32.xlu1 %v1677_v56, %s1454_s26  ;;  %v1711_v7 = vmin.f32 %v416_v5, 6.0 }
  0xfd   : > { %v405_v57 = vpop.f32.mrb[4].mxu0  ;;  %v1750_v15 = vmin.f32 %v417_v13, 6.0 }
  0xfe   : > { %v407_v58 = vpop.f32.mrb[5].mxu0  ;;  %v406_v14 = vadd.f32 %v405_v57, %v1661_v41  ;;  %v1841_v57 = vpop.permute.xlu0 %501 }
  0xff   : > { %v1683_v59 = vpop.f32.mrb[6].mxu0  ;;  %v408_v20 = vadd.f32 %v407_v58, %v1661_v41  ;;  %v1807_v41 = vpop.permute.xlu1 %1059 }
 0x100   : > { %v1687_v61 = vpop.f32.mrb[7].mxu0  ;;  %695 = vrot.lane.b32.xlu0 %v1677_v56, %s1455_s12  ;;  %604 = vrot.lane.b32.xlu1 %v1677_v56, %s1456_s13  ;;  %v418_v16 = vmax.f32 %v406_v14, 0.0  ;;  %v410_v27 = vadd.f32 %v1683_v59, %v1665_v43  ;;  %v430_v59 = vlaneseq }
 0x101   : > { %v419_v22 = vmax.f32 %v408_v20, 0.0  ;;  %v412_v49 = vadd.f32 %v1687_v61, %v1665_v43  ;;  %v433_v61 = vld [vmem:[%s2519_s7] sm:$0x3] }
 0x102   : > { %v1758_v18 = vmin.f32 %v418_v16, 6.0  ;;  %v420_v48 = vmax.f32 %v410_v27, 0.0  ;;  %v464_v62 = vshrl.u32 %v430_v59, 7  ;;  %v1852_v63 = vpop.permute.xlu0 %1106  ;;  %vm461_vm2 = vcmp.ge.s32.totalorder %v433_v61, 1 }
 0x103   : > { %v1777_v23 = vmin.f32 %v419_v22, 6.0  ;;  %v421_v51 = vmax.f32 %v412_v49, 0.0  ;;  %v1817_v52 = vpop.permute.xlu1 %992  ;;  %2573 = vst [vmem:[#allocation22_spill] sm:$0xff] %v1852_v63  ;;  %v462_v13 = vsel %vm461_vm2, 1, %v2521_v2  ;;  %vm629_vm3 = vcmp.lt.s32.totalorder %v433_v61, 15 }
 0x104   : > { %794 = vrot.lane.b32.xlu0 %v1677_v56, %s1457_s17  ;;  %861 = vrot.lane.b32.xlu1 %v1677_v56, %s1458_s18  ;;  %v1815_v50 = vmin.f32 %v420_v48, 6.0  ;;  %2571 = vst [vmem:[#allocation20_spill] sm:$0xff] %v1817_v52  ;;  %v1858_v3 = vsub.s32 0, %v464_v62  ;;  %v1863_v14 = vand.u32 127, %v430_v59  ;;  %v469_v20 = vsub.s32 1, %v464_v62 }
 0x105   : > { %v1823_v53 = vmin.f32 %v421_v51, 6.0  ;;  %v630_v22 = vsel %vm629_vm3, 1, %v2521_v2  ;;  %v2575_v63 = vmov 0  }
 0x106   : > { %2570 = vst [vmem:[#allocation19_spill] sm:$0xff] %v1815_v50  ;;  %v1866_v16 = vrot.slane %v462_v13, %v1858_v3  ;;  %v1874_v49 = vrot.slane %v630_v22, %v1858_v3  ;;  %vm2537_vm4 = vcmp.ge.s32.totalorder %v1863_v14, 16  ;;  %v1877_v51 = vrot.slane %v462_v13, %v469_v20 }
 0x107   : > { %v1825_v43 = vpop.permute.xlu1 %1067  ;;  %v1884_v62 = vrot.slane %v630_v22, %v469_v20  ;;  %vm450_vm11 = vcmp.lt.s32.totalorder %v1863_v14, 17  ;;  %v1919_v24 = vadd.s32 128, %v1863_v14  ;;  %vm2543_vm12 = vcmp.lt.s32.totalorder %v1863_v14, 16 }
 0x108   : > { %1011 = vrot.lane.b32.xlu0 %v1677_v56, %s1459_s19  ;;  %942 = vrot.lane.b32.xlu1 %v1677_v56, %s1460_s20  ;;  %2572 = vst [vmem:[#allocation21_spill] sm:$0xff] %v1825_v43  ;;  %vm471_vm5 = vcmp.ne.s32.totalorder %v1866_v16, 0  ;;  %vm639_vm7 = vcmp.ne.s32.totalorder %v1874_v49, 0  ;;  %vm472_vm8 = vcmp.ne.s32.totalorder %v1877_v51, 0  ;;  %vm2542_vm0 = vcmp.lt.s32.totalorder %v1863_v14, 15 }
 0x109   : > { %vm473_vm6 = vmand %vm2537_vm4, %vm471_vm5  ;;  %vm640_vm9 = vcmp.ne.s32.totalorder %v1884_v62, 0  ;;  %v476_v20 = vsel %vm472_vm8, 1, %v2575_v63  ;;  %vm2553_vm15 = vcmp.lt.s32.totalorder %v1919_v24, 240  ;;  %vm711_vm3 = vcmp.lt.s32.totalorder %v1863_v14, 1 }
 0x10a   : > { %vm641_vm10 = vmand %vm2537_vm4, %vm639_vm7  ;;  %v644_v52 = vsel %vm640_vm9, 1, %v2575_v63  ;;  %v484_v26 = vrot.slane %v476_v20, %v1858_v3 }
 0x10b   : > { %v1835_v54 = vpop.permute.xlu1 %1096  ;;  %v643_v42 = vsel %vm641_vm10, 1, %v2575_v63  ;;  %v652_v12 = vrot.slane %v644_v52, %v1858_v3  ;;  %vm2546_vm10 = vcmp.eq.s32.totalorder %v1866_v16, 1 }
 0x10c   : > { %442 = vrot.lane.b32.xlu0 %v1703_v4, %s1454_s26  ;;  %950 = vrot.lane.b32.xlu1 %v1703_v4, %s1460_s20  ;;  %vm1932_vm14 = vcmp.eq.s32.totalorder %v484_v26, 1 }
 0x10d   : > { %vm1954_vm2 = vcmp.eq.s32.totalorder %v652_v12, 1 }
 0x10f   : > { %v1843_v58 = vpop.permute.xlu1 %1101 }
 0x110   : > { %543 = vrot.lane.b32.xlu0 %v1703_v4, %s1453_s25  ;;  %436 = vrot.lane.b32.xlu1 %v1711_v7, %s1454_s26 }
 0x113   : > { %v1854_v1 = vpop.permute.xlu1 %1111 }
 0x114   : > { %612 = vrot.lane.b32.xlu0 %v1703_v4, %s1456_s13  ;;  %537 = vrot.lane.b32.xlu1 %v1711_v7, %s1453_s25  ;;  %2574 = vst [vmem:[#allocation23_spill] sm:$0xff] %v1854_v1  ;;  %v475_v1 = vsel %vm473_vm6, 1, %v2575_v63  ;;  %vm889_vm6 = vmand %vm2553_vm15, %vm472_vm8  ;;  %vm810_vm8 = vcmp.lt.s32.totalorder %v1863_v14, 127 }
 0x115   : > { %v480_v22 = vrot.slane %v475_v1, %v1858_v3  ;;  %v648_v1 = vrot.slane %v643_v42, %v1858_v3 }
 0x117   : > { %vm1926_vm13 = vcmp.eq.s32.totalorder %v480_v22, 1  ;;  %vm1950_vm1 = vcmp.eq.s32.totalorder %v648_v1, 1 }
 0x118   : > { %703 = vrot.lane.b32.xlu0 %v1703_v4, %s1455_s12  ;;  %606 = vrot.lane.b32.xlu1 %v1711_v7, %s1456_s13 }
 0x11c   : > { %802 = vrot.lane.b32.xlu0 %v1703_v4, %s1457_s17  ;;  %697 = vrot.lane.b32.xlu1 %v1711_v7, %s1455_s12 }
 0x120   : > { %869 = vrot.lane.b32.xlu0 %v1703_v4, %s1458_s18  ;;  %796 = vrot.lane.b32.xlu1 %v1711_v7, %s1457_s17 }
 0x124   : > { %1019 = vrot.lane.b32.xlu0 %v1703_v4, %s1459_s19  ;;  %863 = vrot.lane.b32.xlu1 %v1711_v7, %s1458_s18 }
 0x128   : > { %944 = vrot.lane.b32.xlu0 %v1711_v7, %s1460_s20  ;;  %1013 = vrot.lane.b32.xlu1 %v1711_v7, %s1459_s19 }
 0x12c   : > { %952 = vrot.lane.b32.xlu0 %v1750_v15, %s1460_s20  ;;  %444 = vrot.lane.b32.xlu1 %v1750_v15, %s1454_s26 }
 0x130   : > { %539 = vrot.lane.b32.xlu0 %v1758_v18, %s1453_s25  ;;  %545 = vrot.lane.b32.xlu1 %v1750_v15, %s1453_s25 }
 0x134   : > { %865 = vrot.lane.b32.xlu0 %v1758_v18, %s1458_s18  ;;  %614 = vrot.lane.b32.xlu1 %v1750_v15, %s1456_s13 }
 0x138   : > { %946 = vrot.lane.b32.xlu0 %v1758_v18, %s1460_s20  ;;  %705 = vrot.lane.b32.xlu1 %v1750_v15, %s1455_s12 }
 0x13c   : > { %446 = vrot.lane.b32.xlu0 %v1777_v23, %s1454_s26  ;;  %804 = vrot.lane.b32.xlu1 %v1750_v15, %s1457_s17 }
 0x140   : > { %547 = vrot.lane.b32.xlu0 %v1777_v23, %s1453_s25  ;;  %871 = vrot.lane.b32.xlu1 %v1750_v15, %s1458_s18 }
 0x144   : > { %616 = vrot.lane.b32.xlu0 %v1777_v23, %s1456_s13  ;;  %1021 = vrot.lane.b32.xlu1 %v1750_v15, %s1459_s19 }
 0x148   : > { %707 = vrot.lane.b32.xlu0 %v1777_v23, %s1455_s12  ;;  %438 = vrot.lane.b32.xlu1 %v1758_v18, %s1454_s26 }
 0x14c   : > { %873 = vrot.lane.b32.xlu0 %v1777_v23, %s1458_s18  ;;  %608 = vrot.lane.b32.xlu1 %v1758_v18, %s1456_s13 }
 0x150   : > { %954 = vrot.lane.b32.xlu0 %v1777_v23, %s1460_s20  ;;  %699 = vrot.lane.b32.xlu1 %v1758_v18, %s1455_s12 }
 0x154   : > { %800 = vrot.lane.b32.xlu0 %v1815_v50, %s1457_s17  ;;  %798 = vrot.lane.b32.xlu1 %v1758_v18, %s1457_s17 }
 0x158   : > { %808 = vrot.lane.b32.xlu0 %v1823_v53, %s1457_s17  ;;  %1015 = vrot.lane.b32.xlu1 %v1758_v18, %s1459_s19 }
 0x15c   : > { %1017 = vrot.lane.b32.xlu0 %v1815_v50, %s1459_s19  ;;  %806 = vrot.lane.b32.xlu1 %v1777_v23, %s1457_s17  ;;  %s1291_s17 = sshll.u32 %s1528_s9, 8 }
 0x15d   : > { %s2470_s22 = scalar_lea.hbm %s2520_s8, %s1291_s17 }
 0x160   : > { %1025 = vrot.lane.b32.xlu0 %v1823_v53, %s1459_s19  ;;  %440 = vrot.lane.b32.xlu1 %v1815_v50, %s1454_s26 }
 0x164   : > { %541 = vrot.lane.b32.xlu1 %v1815_v50, %s1453_s25 }
 0x168   : > { %610 = vrot.lane.b32.xlu1 %v1815_v50, %s1456_s13 }
 0x16c   : > { %701 = vrot.lane.b32.xlu1 %v1815_v50, %s1455_s12 }
 0x16e   : > { %v536_v5 = vpop.permute.xlu0 %535  ;;  %v435_v11 = vpop.permute.xlu1 %434 }
 0x170   : > { %867 = vrot.lane.b32.xlu1 %v1815_v50, %s1458_s18 }
 0x172   : > { %v1869_v27 = vpop.permute.xlu0 %695  ;;  %v605_v48 = vpop.permute.xlu1 %604 }
 0x174   : > { %948 = vrot.lane.b32.xlu1 %v1815_v50, %s1460_s20 }
 0x176   : > { %v1880_v59 = vpop.permute.xlu0 %794  ;;  %v1882_v61 = vpop.permute.xlu1 %861 }
 0x178   : > { %448 = vrot.lane.b32.xlu1 %v1823_v53, %s1454_s26 }
 0x17a   : > { %v1894_v13 = vpop.permute.xlu0 %1011  ;;  %v1896_v2 = vpop.permute.xlu1 %942 }
 0x17c   : > { %549 = vrot.lane.b32.xlu1 %v1823_v53, %s1453_s25 }
 0x17e   : > { %v443_v43 = vpop.permute.xlu0 %442  ;;  %v1910_v46 = vpop.permute.xlu1 %950 }
 0x17f   : > { %v451_v6 = vsel %vm450_vm11, %v435_v11, %v443_v43  ;;  %v455_v33 = vsel %vm450_vm11, %v443_v43, %v435_v11  ;;  %v2582_v43 = vmov 0 }
 0x180   : > { %618 = vrot.lane.b32.xlu1 %v1823_v53, %s1456_s13  ;;  %v2583_v43 = vsel %vm1954_vm2, 4294967295, %v2582_v43 }
 0x181   : > { %2584 = vst [vmem:[#allocation24_spill] sm:$0xff] %v2583_v43 }
 0x182   : > { %v544_v9 = vpop.permute.xlu0 %543  ;;  %v1930_v20 = vpop.permute.xlu1 %436 }
 0x183   : > { %v556_v42 = vsel %vm2543_vm12, %v544_v9, %v536_v5  ;;  %v552_v52 = vsel %vm2543_vm12, %v536_v5, %v544_v9  ;;  %v487_v9 = vsel %vm1926_vm13, %v455_v33, 0.0  ;;  %v488_v5 = vsel %vm1932_vm14, %v451_v6, 0.0 }
 0x184   : > { %v564_v26 = vsel %vm2537_vm4, %v556_v42, 0.0  ;;  %709 = vrot.lane.b32.xlu1 %v1823_v53, %s1455_s12  ;;  %vm2545_vm4 = vcmp.eq.s32.totalorder %v1877_v51, 1  ;;  %v589_v42 = vmul.f32 %v1635_v28, %v552_v52  ;;  %v519_v52 = vmul.f32 %v1841_v57, %v487_v9  ;;  %s296_s12 = sand.u32 1, %s1434_s28  }
 0x185   : > { %v588_v12 = vmul.f32 %v1635_v28, %v564_v26  ;;  %v890_v26 = vsel %vm471_vm5, 1, %v2575_v63  ;;  %v891_v28 = vsel %vm889_vm6, 1, %v2575_v63  ;;  %v520_v29 = vmul.f32 %v1841_v57, %v488_v5  ;;  %s1276_s13 = sshll.u32 %s296_s12, 4  ;;  %s1199_s9 = scalar_lea.sflag [#allocation3], %s296_s12 }
 0x186   : > { %v613_v11 = vpop.permute.xlu0 %612  ;;  %v1967_v1 = vpop.permute.xlu1 %537  ;;  %vm2548_vm12 = vcmp.eq.s32.totalorder %v1884_v62, 1  ;;  %v895_v5 = vrot.slane %v890_v26, %v1858_v3  ;;  %vm958_vm5 = vcmp.lt.s32.totalorder %v1863_v14, 112  ;;  %vm2547_vm6 = vcmp.lt.s32.totalorder %v1863_v14, 113 }
 0x187   : > { %v621_v39 = vsel %vm2542_vm0, %v605_v48, %v613_v11  ;;  %v625_v33 = vsel %vm2542_vm0, %v613_v11, %v605_v48  ;;  %vm2549_vm0 = vcmp.eq.s32.totalorder %v1874_v49, 1  ;;  %v597_v50 = vadd.f32 %v589_v42, %v520_v29 }
 0x188   : > { %v655_v6 = vsel %vm1950_vm1, %v625_v33, 0.0  ;;  %v656_v31 = vsel %vm1954_vm2, %v621_v39, 0.0  ;;  %875 = vrot.lane.b32.xlu1 %v1823_v53, %s1458_s18  ;;  %v596_v39 = vadd.f32 %v588_v12, %v519_v52  ;;  %v899_v29 = vrot.slane %v891_v28, %v1858_v3  ;;  %s298_s18 = scalar_lea.vmem [#allocation2], %s1276_s13 }
 0x189   : > { %v679_v48 = vmul.f32 %v1675_v55, %v655_v6  ;;  %v680_v11 = vmul.f32 %v1675_v55, %v656_v31 }
 0x18a   : > { %v704_v33 = vpop.permute.xlu0 %703  ;;  %v1991_v19 = vpop.permute.xlu1 %606 }
 0x18b   : > { %v712_v9 = vsel %vm711_vm3, %v1869_v27, %v704_v33  ;;  %v716_v57 = vsel %vm711_vm3, %v704_v33, %v1869_v27  ;;  %v687_v12 = vadd.f32 %v679_v48, %v596_v39  ;;  %v688_v42 = vadd.f32 %v680_v11, %v597_v50 }
 0x18c   : > { %v722_v31 = vsel %vm2546_vm10, %v716_v57, 0.0  ;;  %v723_v55 = vsel %vm2545_vm4, %v712_v9, 0.0  ;;  %956 = vrot.lane.b32.xlu1 %v1823_v53, %s1460_s20  ;;  %v778_v27 = vmul.f32 %v1733_v10, %v1677_v56  ;;  %v779_v33 = vmul.f32 %v1733_v10, %v1703_v4 }
 0x18d   : > { %v746_v6 = vmul.f32 %v1717_v8, %v722_v31  ;;  %v747_v52 = vmul.f32 %v1717_v8, %v723_v55  ;;  %vm2032_vm4 = vcmp.eq.s32.totalorder %v895_v5, 1  ;;  %vm2036_vm10 = vcmp.eq.s32.totalorder %v899_v29, 1  ;;  %v1143_v55 = vld [vmem:[%s2518_s6] sm:$0xff] }
 0x18e   : > { %v803_v9 = vpop.permute.xlu0 %802  ;;  %v2017_v57 = vpop.permute.xlu1 %697 }
 0x18f   : > { %v754_v26 = vadd.f32 %v746_v6, %v687_v12  ;;  %v755_v28 = vadd.f32 %v747_v52, %v688_v42  ;;  %v811_v50 = vsel %vm810_vm8, %v1880_v59, %v803_v9  ;;  %v815_v56 = vsel %vm810_vm8, %v803_v9, %v1880_v59 }
 0x190   : > { %v821_v4 = vsel %vm2549_vm0, %v811_v50, 0.0  ;;  %v822_v8 = vsel %vm2548_vm12, %v815_v56, 0.0  ;;  %1023 = vrot.lane.b32.xlu1 %v1777_v23, %s1459_s19  ;;  %vm2589_vm12 = vcmp.lt.s32.totalorder %v1863_v14, 16  ;;  %s1213_s19 = sshll.u32 %s298_s18, 4  ;;  %s2472_s19 = int_to_ptr.vmem [resolvable:$true] %s1213_s19 }
 0x191   : > { %v786_v11 = vadd.f32 %v778_v27, %v754_v26  ;;  %v787_v39 = vadd.f32 %v779_v33, %v755_v28  ;;  %v845_v59 = vmul.f32 %v1752_v17, %v821_v4  ;;  %v846_v31 = vmul.f32 %v1752_v17, %v822_v8  ;;  %vm2590_vm0 = vmmov %vm2589_vm12  ;;  %s1380_s23 = scalar_lea.vmem %s2472_s19, 256 }
 0x192   : > { %v870_v12 = vpop.permute.xlu0 %869  ;;  %v2045_v42 = vpop.permute.xlu1 %796  ;;  %v959_v17 = vsel %vm958_vm5, %v1896_v2, %v1910_v46  ;;  %p1381_p11 = scmp.ne.s32.totalorder %s2472_s19, %s1380_s23 }
 0x193   : > { %v878_v5 = vsel %vm2547_vm6, %v1882_v61, %v870_v12  ;;  %v882_v29 = vsel %vm2547_vm6, %v870_v12, %v1882_v61  ;;  %v853_v27 = vadd.f32 %v845_v59, %v786_v11  ;;  %v854_v33 = vadd.f32 %v846_v31, %v787_v39  ;;  %vm1037_vm6 = vmand %vm2553_vm15, %vm640_vm9 }
 0x194   : > { %v902_v6 = vsel %vm2032_vm4, %v878_v5, 0.0  ;;  %v903_v52 = vsel %vm2036_vm10, %v882_v29, 0.0  ;;  %1146 = vperm.xlu1 %1375, %v1143_v55   ;;  %v995_v50 = vmul.f32 %v1789_v25, %v959_v17  ;;  %v1038_v31 = vsel %vm639_vm7, 1, %v2575_v63  ;;  %p1382_p12 = pnand %p1381_p11, %p1545_p5 }
 0x195   : > { %v926_v9 = vmul.f32 %v1771_v21, %v902_v6  ;;  %v927_v26 = vmul.f32 %v1771_v21, %v903_v52  ;;  %vm2591_vm9 = vcmp.ge.s32.totalorder %v1863_v14, 16  ;;  %vm2592_vm7 = vcmp.lt.s32.totalorder %v1863_v14, 15 }
 0x196   : > { %v1020_v28 = vpop.permute.xlu0 %1019  ;;  %v2063_v61 = vpop.permute.xlu1 %863  ;;  %p1383_p13 = pneg %p1382_p12 }
 0x197   : > { %v934_v56 = vadd.f32 %v926_v9, %v853_v27  ;;  %v2066_v4 = vadd.f32 %v927_v26, %v854_v33  ;;  %v1039_v27 = vsel %vm1037_vm6, 1, %v2575_v63  ;;  %v1043_v33 = vrot.slane %v1038_v31, %v1858_v3 }
 0x199   : > { %v2068_v8 = vadd.f32 %v995_v50, %v934_v56  ;;  %vm2125_vm6 = vcmp.eq.s32.totalorder %v1043_v33, 1 }
 0x19a   : > { %v2070_v12 = vpop.permute.xlu0 %944  ;;  %v2072_v5 = vpop.permute.xlu1 %1013 }
 0x19e   : > { %v2074_v11 = vpop.permute.xlu0 %952  ;;  %v445_v39 = vpop.permute.xlu1 %444 }
 0x19f   : > { %v452_v55 = vsel %vm450_vm11, %v1930_v20, %v445_v39  ;;  %v456_v29 = vsel %vm450_vm11, %v445_v39, %v1930_v20 }
 0x1a0   : > { %v489_v9 = vsel %vm1926_vm13, %v456_v29, 0.0  ;;  %v490_v20 = vsel %vm1932_vm14, %v452_v55, 0.0 }
 0x1a1   : > { %v521_v55 = vmul.f32 %v1669_v45, %v489_v9 }
 0x1a2   : > { %v2076_v59 = vpop.permute.xlu0 %539  ;;  %v546_v21 = vpop.permute.xlu1 %545 }
 0x1a3   : > { %v557_v17 = vsel %vm2589_vm12, %v546_v21, %v1967_v1  ;;  %v553_v6 = vsel %vm2590_vm0, %v1967_v1, %v546_v21  ;;  %vm2593_vm12 = vmmov %vm2592_vm7  ;;  %vm2552_vm0 = vcmp.lt.s32.totalorder %v1863_v14, 111 }
 0x1a4   : > { %v566_v52 = vsel %vm2591_vm9, %v557_v17, 0.0  ;;  %v591_v1 = vmul.f32 %v1673_v47, %v553_v6  ;;  %v1047_v6 = vrot.slane %v1039_v27, %v1858_v3  ;;  %v1028_v3 = vsel %vm2552_vm0, %v1894_v13, %v1020_v28 }
 0x1a5   : > { %v590_v56 = vmul.f32 %v1673_v47, %v566_v52  ;;  %v522_v47 = vmul.f32 %v1669_v45, %v490_v20  ;;  %vm2596_vm9 = vcmp.eq.s32.totalorder %v1866_v16, 1 }
 0x1a6   : > { %v2105_v26 = vpop.permute.xlu0 %865  ;;  %v615_v50 = vpop.permute.xlu1 %614 }
 0x1a7   : > { %v622_v39 = vsel %vm2592_vm7, %v1991_v19, %v615_v50  ;;  %v626_v63 = vsel %vm2593_vm12, %v615_v50, %v1991_v19  ;;  %v599_v43 = vadd.f32 %v591_v1, %v522_v47  ;;  %vm2597_vm7 = vcmp.eq.s32.totalorder %v1877_v51, 1 }
 0x1a8   : > { %v657_v21 = vsel %vm1950_vm1, %v626_v63, 0.0  ;;  %v658_v31 = vsel %vm1954_vm2, %v622_v39, 0.0  ;;  %v598_v63 = vadd.f32 %v590_v56, %v521_v55  ;;  %vm2150_vm12 = vcmp.eq.s32.totalorder %v1047_v6, 1 }
 0x1a9   : > { %v681_v29 = vmul.f32 %v1639_v30, %v657_v21  ;;  %v682_v17 = vmul.f32 %v1639_v30, %v658_v31  ;;  %v963_v30 = vsel %vm958_vm5, %v1910_v46, %v1896_v2  ;;  %v1032_v2 = vsel %vm2552_vm0, %v1020_v28, %v1894_v13 }
 0x1aa   : > { %v2129_v52 = vpop.permute.xlu0 %946  ;;  %v706_v50 = vpop.permute.xlu1 %705  ;;  %v780_v21 = vmul.f32 %v1647_v34, %v1711_v7  ;;  %v972_v13 = vsel %vm2553_vm15, %v963_v30, 0.0  ;;  %v1050_v7 = vsel %vm2125_vm6, %v1028_v3, 0.0  ;;  %v1051_v28 = vsel %vm2150_vm12, %v1032_v2, 0.0 }
 0x1ab   : > { %v713_v9 = vsel %vm711_vm3, %v2017_v57, %v706_v50  ;;  %v717_v45 = vsel %vm711_vm3, %v706_v50, %v2017_v57  ;;  %v689_v20 = vadd.f32 %v681_v29, %v598_v63  ;;  %v690_v56 = vadd.f32 %v682_v17, %v599_v43 }
 0x1ac   : > { %v724_v27 = vsel %vm2596_vm9, %v717_v45, 0.0  ;;  %v725_v33 = vsel %vm2597_vm7, %v713_v9, 0.0  ;;  %v781_v43 = vmul.f32 %v1647_v34, %v1750_v15  ;;  %vm2600_vm9 = vcmp.eq.s32.totalorder %v1874_v49, 1 }
 0x1ad   : > { %v748_v1 = vmul.f32 %v1643_v32, %v724_v27  ;;  %v749_v57 = vmul.f32 %v1643_v32, %v725_v33  ;;  %vm2601_vm7 = vcmp.eq.s32.totalorder %v1884_v62, 1  ;;  %v996_v30 = vmul.f32 %v1789_v25, %v972_v13 }
 0x1ae   : > { %v2157_v46 = vpop.permute.xlu0 %446  ;;  %v805_v31 = vpop.permute.xlu1 %804  ;;  %v1074_v3 = vmul.f32 %v1807_v41, %v1050_v7  ;;  %v960_v27 = vsel %vm958_vm5, %v2070_v12, %v2074_v11  ;;  %v1075_v25 = vmul.f32 %v1807_v41, %v1051_v28 }
 0x1af   : > { %v756_v55 = vadd.f32 %v748_v1, %v689_v20  ;;  %v757_v47 = vadd.f32 %v749_v57, %v690_v56  ;;  %v812_v32 = vsel %vm810_vm8, %v2045_v42, %v805_v31  ;;  %v816_v29 = vsel %vm810_vm8, %v805_v31, %v2045_v42 }
 0x1b0   : > { %v823_v34 = vsel %vm2600_vm9, %v812_v32, 0.0  ;;  %v824_v15 = vsel %vm2601_vm7, %v816_v29, 0.0  ;;  %v964_v42 = vsel %vm958_vm5, %v2074_v11, %v2070_v12  ;;  %vm2602_vm9 = vcmp.lt.s32.totalorder %v1863_v14, 113 }
 0x1b1   : > { %v788_v17 = vadd.f32 %v780_v21, %v756_v55  ;;  %v789_v6 = vadd.f32 %v781_v43, %v757_v47  ;;  %v847_v50 = vmul.f32 %v1651_v36, %v823_v34  ;;  %v848_v63 = vmul.f32 %v1651_v36, %v824_v15  ;;  %vm2603_vm7 = vmmov %vm2602_vm9 }
 0x1b2   : > { %v2185_v9 = vpop.permute.xlu0 %547  ;;  %v872_v45 = vpop.permute.xlu1 %871  ;;  %v974_v33 = vsel %vm2553_vm15, %v964_v42, 0.0  ;;  %v1004_v12 = vadd.f32 %v996_v30, %v2066_v4  ;;  %v1082_v34 = vadd.f32 %v1074_v3, %v2068_v8 }
 0x1b3   : > { %v879_v20 = vsel %vm2602_vm9, %v2063_v61, %v872_v45  ;;  %v883_v36 = vsel %vm2603_vm7, %v872_v45, %v2063_v61  ;;  %v855_v11 = vadd.f32 %v847_v50, %v788_v17  ;;  %v856_v57 = vadd.f32 %v848_v63, %v789_v6 }
 0x1b4   : > { %v904_v56 = vsel %vm2032_vm4, %v879_v20, 0.0  ;;  %v905_v1 = vsel %vm2036_vm10, %v883_v36, 0.0  ;;  %v997_v61 = vmul.f32 %v1659_v40, %v960_v27  ;;  %v998_v41 = vmul.f32 %v1659_v40, %v974_v33 }
 0x1b5   : > { %v928_v2 = vmul.f32 %v1655_v38, %v904_v56  ;;  %v929_v21 = vmul.f32 %v1655_v38, %v905_v1  ;;  %v1083_v7 = vadd.f32 %v1075_v25, %v1004_v12  ;;  %v1114_v27 = vadd.f32 %v1835_v54, %v1082_v34 }
 0x1b6   : > { %v2209_v43 = vpop.permute.xlu0 %616  ;;  %v1022_v31 = vpop.permute.xlu1 %1021  ;;  %vm2604_vm9 = vcmp.eq.s32.totalorder %v1874_v49, 1  ;;  %vm2605_vm7 = vcmp.eq.s32.totalorder %v1884_v62, 1 }
 0x1b7   : > { %v1029_v55 = vsel %vm2552_vm0, %v2072_v5, %v1022_v31  ;;  %v1033_v4 = vsel %vm2552_vm0, %v1022_v31, %v2072_v5  ;;  %v936_v47 = vadd.f32 %v928_v2, %v855_v11  ;;  %v937_v32 = vadd.f32 %v929_v21, %v856_v57  ;;  %vm2606_vm0 = vmmov %vm2604_vm9 }
 0x1b8   : > { %v1052_v38 = vsel %vm2125_vm6, %v1029_v55, 0.0  ;;  %v1053_v29 = vsel %vm2150_vm12, %v1033_v4, 0.0  ;;  %v1115_v50 = vadd.f32 %v1835_v54, %v1083_v7  ;;  %v1122_v36 = vmax.f32 %v1114_v27, 0.0  ;;  %vm2607_vm15 = vmmov %vm2605_vm7 }
 0x1b9   : > { %v1076_v13 = vmul.f32 %v1667_v44, %v1052_v38  ;;  %v1077_v40 = vmul.f32 %v1667_v44, %v1053_v29  ;;  %v1005_v15 = vadd.f32 %v997_v61, %v936_v47  ;;  %v1006_v5 = vadd.f32 %v998_v41, %v937_v32 }
 0x1ba   : > { %v2226_v28 = vpop.permute.xlu0 %707  ;;  %v439_v42 = vpop.permute.xlu1 %438  ;;  %v1123_v33 = vmax.f32 %v1115_v50, 0.0  ;;  %v1130_v57 = vmin.f32 %v1122_v36, 6.0 }
 0x1bb   : > { %v1084_v17 = vadd.f32 %v1076_v13, %v1005_v15  ;;  %v1085_v6 = vadd.f32 %v1077_v40, %v1006_v5  ;;  %v453_v62 = vsel %vm450_vm11, %v439_v42, %v2157_v46 }
 0x1bc   : > { %v1131_v56 = vmin.f32 %v1123_v33, 6.0  ;;  %v492_v33 = vsel %vm1932_vm14, %v453_v62, 0.0 }
 0x1bd   : > { %v1117_v30 = vadd.f32 %v1843_v58, %v1085_v6  ;;  %v1116_v44 = vadd.f32 %v1843_v58, %v1084_v17  ;;  %v457_v17 = vsel %vm450_vm11, %v2157_v46, %v439_v42 }
 0x1be   : > { %v874_v63 = vpop.permute.xlu0 %873  ;;  %v609_v45 = vpop.permute.xlu1 %608  ;;  %v491_v50 = vsel %vm1926_vm13, %v457_v17, 0.0 }
 0x1bf   : > { %v1125_v3 = vmax.f32 %v1117_v30, 0.0  ;;  %v1124_v25 = vmax.f32 %v1116_v44, 0.0  ;;  %v2286_v44 = vmul.f32 %v1649_v35, %v1758_v18  ;;  %v523_v46 = vmul.f32 %v1685_v60, %v491_v50  ;;  %v2625_v50 = vld [vmem:[#allocation9_spill] sm:$0xff] }
 0x1c1   : > { %v1133_v1 = vmin.f32 %v1125_v3, 6.0  ;;  %v1132_v2 = vmin.f32 %v1124_v25, 6.0  ;;  %v2308_v25 = vmul.f32 %v1649_v35, %v1777_v23 }
 0x1c2   : > { %v2232_v20 = vpop.permute.xlu0 %954  ;;  %v700_v8 = vpop.permute.xlu1 %699 }
 0x1c3   : > { %v1140_v21 = vpack.c.bf16 %v1133_v1, %v1131_v56  ;;  %v1139_v31 = vpack.c.bf16 %v1132_v2, %v1130_v57  ;;  %v718_v36 = vsel %vm711_vm3, %v2226_v28, %v700_v8  ;;  %v2615_v56 = vld [vmem:[#allocation19_spill] sm:$0xff]  ;;  %v2616_v1 = vld [vmem:[#allocation16_spill] sm:$0xff]  ;;  %v524_v57 = vmul.f32 %v1685_v60, %v492_v33 }
 0x1c5   : > { %1153 = vmatprep.subr.bf16.mxu1 %v1140_v21 }
 0x1c6   : > { %v801_v12 = vpop.permute.xlu0 %800  ;;  %v799_v11 = vpop.permute.xlu1 %798  ;;  %1154 = vmatpush1.bf16.msra.mxu1 %v1139_v31 }
 0x1ca   : > { %v809_v54 = vpop.permute.xlu0 %808  ;;  %v2234_v61 = vpop.permute.xlu1 %1015 }
 0x1cb   : > { %v814_v58 = vsel %vm810_vm8, %v801_v12, %v809_v54  ;;  %v818_v41 = vsel %vm810_vm8, %v809_v54, %v801_v12  ;;  %v2617_v12 = vld [vmem:[#allocation5_spill] sm:$0xff] }
 0x1cc   : > { %v2242_v55 = vsel %vm2604_vm9, %v814_v58, 0.0  ;;  %v2246_v4 = vsel %vm2605_vm7, %v818_v41, 0.0  ;;  %vm2611_vm9 = vcmp.lt.s32.totalorder %v1863_v14, 15 }
 0x1cd   : > { %v623_v42 = vsel %vm2611_vm9, %v609_v45, %v2209_v43  ;;  %vm2612_vm7 = vmmov %vm2611_vm9  ;;  %vm2620_vm9 = vcmp.eq.s32.totalorder %v1877_v51, 1 }
 0x1ce   : > { %v807_v47 = vpop.permute.xlu1 %806  ;;  %v660_v2 = vsel %vm1954_vm2, %v623_v42, 0.0  ;;  %v1018_v33 = vpop.permute.xlu0 %1017 }
 0x1cf   : > { %v813_v32 = vsel %vm810_vm8, %v799_v11, %v807_v47  ;;  %v817_v38 = vsel %vm810_vm8, %v807_v47, %v799_v11  ;;  %vm2608_vm8 = vcmp.lt.s32.totalorder %v1863_v14, 16  ;;  %v2622_v47 = vld [vmem:[#allocation6_spill] sm:$0xff] }
 0x1d0   : > { %v2254_v29 = vsel %vm2606_vm0, %v813_v32, 0.0  ;;  %v2258_v13 = vsel %vm2607_vm15, %v817_v38, 0.0  ;;  %v558_v49 = vsel %vm2608_vm8, %v2185_v9, %v2076_v59  ;;  %vm2609_vm15 = vmmov %vm2608_vm8  ;;  %vm2610_vm0 = vcmp.ge.s32.totalorder %v1863_v14, 16 }
 0x1d1   : > { %v554_v30 = vsel %vm2609_vm15, %v2076_v59, %v2185_v9  ;;  %v568_v27 = vsel %vm2610_vm0, %v558_v49, 0.0  ;;  %v627_v59 = vsel %vm2612_vm7, %v2209_v43, %v609_v45  ;;  %vm2613_vm8 = vcmp.lt.s32.totalorder %v1863_v14, 113 }
 0x1d2   : > { %v441_v40 = vpop.permute.xlu1 %440  ;;  %v880_v3 = vsel %vm2613_vm8, %v2105_v26, %v874_v63  ;;  %vm2614_vm15 = vmmov %vm2613_vm8  ;;  %v2312_v43 = vmul.f32 %v2616_v1, %v2615_v56  ;;  %v2316_v45 = vmul.f32 %v2616_v1, %v1823_v53  ;;  %v592_v11 = vmul.f32 %v2617_v12, %v568_v27 }
 0x1d3   : > { %v884_v18 = vsel %vm2614_vm15, %v874_v63, %v2105_v26  ;;  %v714_v26 = vsel %vm711_vm3, %v700_v8, %v2226_v28  ;;  %v593_v63 = vmul.f32 %v2617_v12, %v554_v30  ;;  %v659_v35 = vsel %vm1950_vm1, %v627_v59, 0.0 }
 0x1d4   : > { %v600_v21 = vadd.f32 %v592_v11, %v523_v46  ;;  %v906_v53 = vsel %vm2032_vm4, %v880_v3, 0.0  ;;  %v907_v31 = vsel %vm2036_vm10, %v884_v18, 0.0  ;;  %vm2619_vm0 = vcmp.eq.s32.totalorder %v1866_v16, 1  ;;  %v2626_v46 = vld [vmem:[#allocation7_spill] sm:$0xff]  ;;  %v2627_v18 = vld [vmem:[#allocation13_spill] sm:$0xff] }
 0x1d5   : > { %v726_v28 = vsel %vm2619_vm0, %v718_v36, 0.0  ;;  %v727_v60 = vsel %vm2620_vm9, %v714_v26, 0.0  ;;  %vm2621_vm7 = vcmp.lt.s32.totalorder %v1863_v14, 16  ;;  %v683_v32 = vmul.f32 %v2622_v47, %v659_v35 }
 0x1d6   : > { %v542_v7 = vpop.permute.xlu1 %541  ;;  %v684_v38 = vmul.f32 %v2622_v47, %v660_v2  ;;  %vm2623_vm8 = vmmov %vm2621_vm7  ;;  %vm2624_vm15 = vcmp.ge.s32.totalorder %v1863_v14, 16  ;;  %v601_v62 = vadd.f32 %v593_v63, %v524_v57  ;;  %v2349_v30 = vmul.f32 %v2625_v50, %v906_v53  ;;  %v2630_v63 = vld [vmem:[#allocation12_spill] sm:$0xff]  ;;  %v2631_v2 = vld [vmem:[#allocation14_spill] sm:$0xff] }
 0x1d7   : > { %v2352_v27 = vmul.f32 %v2625_v50, %v907_v31  ;;  %v750_v42 = vmul.f32 %v2626_v46, %v726_v28  ;;  %v691_v11 = vadd.f32 %v683_v32, %v600_v21  ;;  %v2633_v47 = vld [vmem:[#allocation8_spill] sm:$0xff] }
 0x1d8   : > { %v692_v26 = vadd.f32 %v684_v38, %v601_v62  ;;  %v2636_v62 = vld [vmem:[#allocation15_spill] sm:$0xff] }
 0x1d9   : > { %v758_v21 = vadd.f32 %v750_v42, %v691_v11 }
 0x1da   : > { %v611_v34 = vpop.permute.xlu1 %610 }
 0x1de   : > { %v2260_v15 = vpop.permute.xlu1 %701 }
 0x1e2   : > { %v2262_v5 = vpop.permute.xlu1 %867 }
 0x1e6   : > { %v2271_v6 = vpop.permute.xlu1 %948 }
 0x1ea   : > { %v449_v9 = vpop.permute.xlu1 %448 }
 0x1eb   : > { %v454_v54 = vsel %vm450_vm11, %v441_v40, %v449_v9  ;;  %v458_v58 = vsel %vm450_vm11, %v449_v9, %v441_v40  ;;  %v965_v40 = vsel %vm958_vm5, %v2232_v20, %v2129_v52  ;;  %vm2628_vm11 = vcmp.lt.s32.totalorder %v1863_v14, 15 }
 0x1ec   : > { %v493_v59 = vsel %vm1926_vm13, %v458_v58, 0.0  ;;  %v494_v9 = vsel %vm1932_vm14, %v454_v54, 0.0  ;;  %vm2629_vm0 = vmmov %vm2628_vm11  ;;  %vm2632_vm13 = vcmp.lt.s32.totalorder %v1919_v24, 240  ;;  %vm2634_vm14 = vcmp.eq.s32.totalorder %v1866_v16, 1 }
 0x1ed   : > { %v525_v57 = vmul.f32 %v2630_v63, %v493_v59  ;;  %v526_v35 = vmul.f32 %v2630_v63, %v494_v9  ;;  %v976_v22 = vsel %vm2632_vm13, %v965_v40, 0.0 }
 0x1ee   : > { %v550_v8 = vpop.permute.xlu1 %549 }
 0x1ef   : > { %v559_v41 = vsel %vm2621_vm7, %v550_v8, %v542_v7  ;;  %v555_v17 = vsel %vm2623_vm8, %v542_v7, %v550_v8  ;;  %v751_v7 = vmul.f32 %v2626_v46, %v727_v60  ;;  %v1026_v8 = vpop.permute.xlu0 %1025 }
 0x1f0   : > { %v570_v49 = vsel %vm2624_vm15, %v559_v41, 0.0  ;;  %v595_v56 = vmul.f32 %v2627_v18, %v555_v17 }
 0x1f1   : > { %v594_v36 = vmul.f32 %v2627_v18, %v570_v49  ;;  %v759_v28 = vadd.f32 %v751_v7, %v692_v26 }
 0x1f2   : > { %v619_v3 = vpop.permute.xlu1 %618  ;;  %v603_v54 = vadd.f32 %v595_v56, %v526_v35 }
 0x1f3   : > { %v624_v1 = vsel %vm2628_vm11, %v611_v34, %v619_v3  ;;  %v628_v12 = vsel %vm2629_vm0, %v619_v3, %v611_v34  ;;  %v961_v34 = vsel %vm958_vm5, %v2129_v52, %v2232_v20  ;;  %v602_v60 = vadd.f32 %v594_v36, %v525_v57  ;;  %v2644_v57 = vld [vmem:[#allocation20_spill] sm:$0xff] }
 0x1f4   : > { %v661_v37 = vsel %vm1950_vm1, %v628_v12, 0.0  ;;  %v662_v0 = vsel %vm1954_vm2, %v624_v1, 0.0  ;;  %v849_v52 = vmul.f32 %v2633_v47, %v2254_v29  ;;  %v850_v20 = vmul.f32 %v2633_v47, %v2258_v13  ;;  %vm2635_vm1 = vmmov %vm2620_vm9  ;;  %v2642_v12 = vld [vmem:[#allocation18_spill] sm:$0xff] }
 0x1f5   : > { %v685_v53 = vmul.f32 %v2631_v2, %v661_v37  ;;  %v686_v31 = vmul.f32 %v2631_v2, %v662_v0  ;;  %v791_v46 = vadd.f32 %v2308_v25, %v759_v28  ;;  %vm2637_vm2 = vcmp.lt.s32.totalorder %v1863_v14, 111 }
 0x1f6   : > { %v710_v23 = vpop.permute.xlu1 %709  ;;  %v1031_v29 = vsel %vm2637_vm2, %v1018_v33, %v1026_v8  ;;  %vm2639_vm9 = vcmp.lt.s32.totalorder %v1863_v14, 113 }
 0x1f7   : > { %v715_v58 = vsel %vm711_vm3, %v2260_v15, %v710_v23  ;;  %v719_v41 = vsel %vm711_vm3, %v710_v23, %v2260_v15  ;;  %v693_v17 = vadd.f32 %v685_v53, %v602_v60  ;;  %v694_v49 = vadd.f32 %v686_v31, %v603_v54  ;;  %vm2638_vm3 = vmmov %vm2637_vm2 }
 0x1f8   : > { %v728_v32 = vsel %vm2634_vm14, %v719_v41, 0.0  ;;  %v729_v38 = vsel %vm2635_vm1, %v715_v58, 0.0  ;;  %v790_v15 = vadd.f32 %v2286_v44, %v758_v21  ;;  %v1035_v16 = vsel %vm2638_vm3, %v1026_v8, %v1018_v33  ;;  %vm2640_vm7 = vmmov %vm2639_vm9  ;;  %v2641_v33 = vld [vmem:[#allocation17_spill] sm:$0xff]  ;;  %v2645_v21 = vld [vmem:[#allocation10_spill] sm:$0xff] }
 0x1f9   : > { %v752_v50 = vmul.f32 %v2636_v62, %v728_v32  ;;  %v753_v40 = vmul.f32 %v2636_v62, %v729_v38  ;;  %v858_v9 = vadd.f32 %v850_v20, %v791_v46  ;;  %v851_v18 = vmul.f32 %v2641_v33, %v2242_v55  ;;  %v2646_v8 = vld [vmem:[#allocation11_spill] sm:$0xff]  ;;  %v2649_v32 = vld [vmem:[#allocation21_spill] sm:$0xff] }
 0x1fa   : > { %v876_v13 = vpop.permute.xlu1 %875  ;;  %v857_v44 = vadd.f32 %v849_v52, %v790_v15  ;;  %v852_v36 = vmul.f32 %v2641_v33, %v2246_v4  ;;  %v1057_v10 = vsel %vm2150_vm12, %v1035_v16, 0.0  ;;  %v999_v28 = vmul.f32 %v2645_v21, %v961_v34 }
 0x1fb   : > { %v760_v42 = vadd.f32 %v752_v50, %v693_v17  ;;  %v761_v51 = vadd.f32 %v753_v40, %v694_v49  ;;  %v881_v7 = vsel %vm2639_vm9, %v2262_v5, %v876_v13  ;;  %v885_v59 = vsel %vm2640_vm7, %v876_v13, %v2262_v5  ;;  %v2650_v50 = vld [vmem:[#allocation23_spill] sm:$0xff] }
 0x1fc   : > { %v908_v25 = vsel %vm2032_vm4, %v881_v7, 0.0  ;;  %v909_v3 = vsel %vm2036_vm10, %v885_v59, 0.0  ;;  %v1056_v5 = vsel %vm2125_vm6, %v1031_v29, 0.0  ;;  %v939_v0 = vadd.f32 %v2352_v27, %v858_v9  ;;  %vm2643_vm4 = vmmov %vm2632_vm13  ;;  %v1138_v9 = vld [vmem:[%s2517_s5] sm:$0xf] }
 0x1fd   : > { %v792_v56 = vadd.f32 %v2312_v43, %v760_v42  ;;  %v793_v1 = vadd.f32 %v2316_v45, %v761_v51  ;;  %v932_v11 = vmul.f32 %v2642_v12, %v908_v25  ;;  %v933_v48 = vmul.f32 %v2642_v12, %v909_v3  ;;  %vm2647_vm10 = vmmov %vm2637_vm2  ;;  %v1379_v12 = vld [vmem:[%s1577_s10 + $0x8] sm:$0xff] }
 0x1fe   : > { %v957_v26 = vpop.permute.xlu1 %956  ;;  %v938_v45 = vadd.f32 %v2349_v30, %v857_v44  ;;  %v1000_v23 = vmul.f32 %v2645_v21, %v976_v22  ;;  %v1080_v60 = vmul.f32 %v2646_v8, %v1056_v5 }
 0x1ff   : > { %v859_v37 = vadd.f32 %v851_v18, %v792_v56  ;;  %v860_v55 = vadd.f32 %v852_v36, %v793_v1  ;;  %v962_v4 = vsel %vm958_vm5, %v2271_v6, %v957_v26  ;;  %v966_v43 = vsel %vm958_vm5, %v957_v26, %v2271_v6  ;;  %vm2648_vm5 = vmmov %vm2637_vm2  ;;  %v1378_v1 = vld [vmem:[%s1577_s10] sm:$0xff]  ;;  %s1461_s10 = smov [#allocation2]  }
 0x200   : > { %v978_v63 = vsel %vm2643_vm4, %v966_v43, 0.0  ;;  %v1001_v35 = vmul.f32 %v2644_v57, %v962_v4  ;;  %v1081_v6 = vmul.f32 %v2646_v8, %v1057_v10  ;;  %v1007_v41 = vadd.f32 %v999_v28, %v938_v45  ;;  %s1384_s24 = sshll.u32 %s1461_s10, 4  ;;  %s1385_s24 = int_to_ptr.vmem [resolvable:$false] %s1384_s24 }
 0x201   : > { %v940_v2 = vadd.f32 %v932_v11, %v859_v37  ;;  %v941_v53 = vadd.f32 %v933_v48, %v860_v55  ;;  %v1002_v31 = vmul.f32 %v2644_v57, %v978_v63  ;;  %v1008_v47 = vadd.f32 %v1000_v23, %v939_v0  ;;  %s1386_s25 = scalar_lea.vmem %s1385_s24, 512  ;;  %p1387_p0 = scmp.lt.s32.totalorder %s2472_s19, %s1385_s24 }
 0x202   : > { %v1024_v30 = vpop.permute.xlu1 %1023  ;;  %p1388_p1 = scmp.lt.s32.totalorder %s1386_s25, %s1380_s23 }
 0x203   : > { %v1009_v54 = vadd.f32 %v1001_v35, %v940_v2  ;;  %v1010_v27 = vadd.f32 %v1002_v31, %v941_v53  ;;  %v1030_v24 = vsel %vm2647_vm10, %v2234_v61, %v1024_v30  ;;  %v1034_v58 = vsel %vm2648_vm5, %v1024_v30, %v2234_v61  ;;  %v2651_v61 = vld [vmem:[#allocation22_spill] sm:$0xff] }
 0x204   : > { %v1054_v34 = vsel %vm2125_vm6, %v1030_v24, 0.0  ;;  %v1055_v22 = vsel %vm2150_vm12, %v1034_v58, 0.0  ;;  %vm1149_vm6 = vcmask 261120   ;;  %p1389_p2 = por %p1388_p1, %p1387_p0 }
 0x205   : > { %v1088_v52 = vadd.f32 %v1080_v60, %v1009_v54  ;;  %v1089_v20 = vadd.f32 %v1081_v6, %v1010_v27  ;;  %v1078_v38 = vmul.f32 %v2649_v32, %v1054_v34  ;;  %v1079_v17 = vmul.f32 %v2649_v32, %v1055_v22 }
 0x206   : > { %p1390_p3 = pnand %p1389_p2, %p1383_p13 }
 0x207   : > { %v1086_v49 = vadd.f32 %v1078_v38, %v1007_v41  ;;  %v1087_v62 = vadd.f32 %v1079_v17, %v1008_v47  ;;  %v1121_v40 = vadd.f32 %v2650_v50, %v1089_v20  ;;  %v1120_v14 = vadd.f32 %v2650_v50, %v1088_v52 }
 0x209   : > { %v1119_v15 = vadd.f32 %v2651_v61, %v1087_v62  ;;  %v1129_v46 = vmax.f32 %v1121_v40, 0.0  ;;  %v1118_v19 = vadd.f32 %v2651_v61, %v1086_v49  ;;  %v1128_v39 = vmax.f32 %v1120_v14, 0.0 }
 0x20b   : > { %v1127_v29 = vmax.f32 %v1119_v15, 0.0  ;;  %v1126_v16 = vmax.f32 %v1118_v19, 0.0  ;;  %v1137_v42 = vmin.f32 %v1129_v46, 6.0  ;;  %v1136_v7 = vmin.f32 %v1128_v39, 6.0 }
 0x20d   : > { %v1135_v13 = vmin.f32 %v1127_v29, 6.0  ;;  %v1134_v51 = vmin.f32 %v1126_v16, 6.0 }
 0x20f   : > { %v1142_v59 = vpack.c.bf16 %v1137_v42, %v1135_v13  ;;  %v1141_v44 = vpack.c.bf16 %v1136_v7, %v1134_v51 }
 0x211   : > { %1155 = vmatprep.subr.bf16.mxu1 %v1142_v59 }
 0x212   : > { %1156 = vmatpush1.bf16.msra.mxu1 %v1141_v44 }
 0x213   : > { %v1147_v25 = vpop.permute.xlu1 %1146 }
 0x215   : > { %1284 = vmatmul.mubr.msk.bf16.vlgmr.msra.gmra.mrb[0].mxu1 %vm1149_vm6, %v1138_v9 }
 0x2e8   : > { %v1187_v3 = vpop.f32.mrb[0].mxu1 }
 0x2e9   : > { %v1188_v33 = vadd.f32 %v1187_v3, %v1147_v25  ;;  %v1189_v18 = vpop.f32.mrb[1].mxu1 }
 0x2ea   : > { %v1190_v36 = vadd.f32 %v1189_v18, %v1147_v25  ;;  %v1191_v56 = vpop.f32.mrb[2].mxu1 }
 0x2eb   : > { %v1194_v5 = vadd.f32 %v1378_v1, %v1188_v33  ;;  %v1192_v10 = vpop.f32.mrb[3].mxu1 }
 0x2ec   : > { %v1195_v11 = vadd.f32 %v1379_v12, %v1190_v36 }
 0x2ed   : > { %1196 = vst [vmem:[%s298_s18] sm:$0xff] %v1194_v5 }
 0x2ee   : > { %1197 = vst [vmem:[%s298_s18 + $0x8] sm:$0xff] %v1195_v11 }
 0x2ef   : > { %1393 = shalt.err (!%p1390_p3)
}
 0x2f0   : > { %s1394_s26 = scalar_lea.hbm %s2470_s22, 256  ;;  %s1398_s17 = scalar_lea.hbm %s2520_s8, 512 }
 0x2f1   : > { %p1395_p4 = scmp.ne.s32.totalorder %s2470_s22, %s1394_s26  ;;  %p1399_p9 = scmp.lt.u32.totalorder %s2470_s22, %s2520_s8 }
 0x2f2   : > { %p1400_p10 = scmp.lt.u32.totalorder %s1398_s17, %s1394_s26  ;;  %p1402_p12 = scmp.lt.u32.totalorder %s1394_s26, %s2470_s22 }
 0x2f3   : > { %p1396_p7 = pnand %p1395_p4, %p1545_p5 }
 0x2f4   : > { %p1401_p11 = por %p1400_p10, %p1399_p9 }
 0x2f5   : > { %p1397_p8 = pneg %p1396_p7 }
 0x2f6   : > { %p1403_p13 = por %p1402_p12, %p1401_p11 }
 0x2f8   : > { %p1404_p0 = pnand %p1403_p13, %p1397_p8 }
 0x2fa   : > { %1407 = shalt.err (!%p1404_p0)
}
 0x2fb   : > { %1292 = dma.vmem_to_hbm [thread:$0]  (%p1545_p5), %s2472_s19, 256, %s2470_s22, %s1199_s9  }
 0x2fc PF: > { %p1298_p1 = scmp.ge.s32.totalorder %s1442_s30, 2  ;;  %s1225_s21 = sand.u32 1, %s1430_s27  }
 0x2fd   : > { %s1226_s23 = scalar_lea.sflag [#allocation3], %s1225_s21 }
 0x2fe   : > { %p1295_p2 = pnand %p1298_p1, %p1549_p6 }
 0x300   : > { %1425 = dma.done.wait (!%p1295_p2), %s1226_s23, 256  }
 0x301   : > { %1427 = vsyncadd (!%p1295_p2), %s1226_s23, 4294967040  ;;  %p18_p3 = scmp.ge.s32.totalorder %s1532_s11, 4   ;;  %s2652_s27 = smov %s1434_s28 }
 0x302   : > { %s2653_s28 = smov %s1438_s29  ;;  %s2654_s29 = smov %s1543_s14 }
 0x303   : > { %s2655_s30 = smov %s1532_s11  ;;  %20 = sbr.rel (!%p18_p3) target bundleno = 3 (0x3), region = 87 }
 0x30a   :  { %1231 = vsyncpa [#allocation3], 1 }
 0x30b   :  { %1233 = vsyncpa [#allocation3 + $0x1], 1 }

</bundles_post_ra>
